<compile_context>
chip_gen: v6e
topology: v6e:2x2x1
jax: 0.10.0
libtpu: 0.0.40
codegen_flags: <defaults>
</compile_context>

<pallas_src>
import functools

import jax
import jax.numpy as jnp
from jax import lax
from jax.experimental import pallas as pl
from jax.experimental.pallas import tpu as pltpu

DROPOUT_P = 0.2
N_EMBD = 256

_INT23_MASK = (1 << 23) - 1
_POS_MASK = 0x7FFFFFFF  # drop sign bit so '>>' (arithmetic) == logical shift


def _mix32(x):
    """Murmur3-style finalizer on int32 (sign bit masked before shifts)."""
    x = jnp.bitwise_xor(x, (x & jnp.int32(_POS_MASK)) >> 16)
    x = x * jnp.int32(-2048144789)        # 0x85EBCA6B
    x = jnp.bitwise_xor(x, (x & jnp.int32(_POS_MASK)) >> 13)
    x = x * jnp.int32(-1028477387)        # 0xC2B2AE35
    x = jnp.bitwise_xor(x, (x & jnp.int32(_POS_MASK)) >> 16)
    return x


def _ffn_kernel(seed_ref, x_ref, w1_ref, b1_ref, w2_ref, b2_ref, o_ref,
                *, p, training, tm, C):
    # ---- Linear 1 (bf16 MXU matmul, f32 accumulation) + bias + ReLU (f32) ----
    h = jnp.dot(x_ref[...], w1_ref[...],
                preferred_element_type=jnp.float32) + b1_ref[...]
    h = jnp.maximum(h, 0.0)

    # ---- Linear 2 (cast hidden to bf16 only at the MXU input) ----
    y = jnp.dot(h.astype(w2_ref.dtype), w2_ref[...],
                preferred_element_type=jnp.float32) + b2_ref[...]

    # ---- Inverted dropout: zero with prob p, scale survivors by 1/(1-p) ----
    if training and p > 0.0:
        row0 = pl.program_id(0) * tm
        rows = lax.broadcasted_iota(jnp.int32, (tm, C), 0) + row0
        cols = lax.broadcasted_iota(jnp.int32, (tm, C), 1)
        # Hash of (seed, absolute element index) -> tiling-independent mask.
        idx = rows * jnp.int32(C) + cols
        bits = _mix32(idx * jnp.int32(-1640531527) + seed_ref[0])
        u01 = (jnp.bitwise_and(bits, jnp.int32(_INT23_MASK))
               .astype(jnp.float32)) * jnp.float32(1.0 / (1 << 23))
        scale = jnp.float32(1.0 / (1.0 - p))
        y = y * jnp.where(u01 >= jnp.float32(p), scale, jnp.float32(0.0))

    o_ref[...] = y.astype(o_ref.dtype)


def feedforward(x, w1, b1, w2, b2, seed, *, p=DROPOUT_P, training=True,
                tm=256):
    """x: (B, T, C) f32. w1: (C, 4C), b1: (1, 4C), w2: (4C, C), b2: (1, C)."""
    B, T, C = x.shape
    H = w1.shape[1]
    M = B * T
    assert M % 8 == 0 and C % 128 == 0 and H % 128 == 0

    # Pick the largest tile <= tm (multiple of 8) that divides M.
    tm = min(tm, M)
    while M % tm:
        tm -= 8

    x2 = x.reshape(M, C).astype(jnp.bfloat16)
    w1b = w1.astype(jnp.bfloat16)
    w2b = w2.astype(jnp.bfloat16)
    b1f = b1.astype(jnp.float32)
    b2f = b2.astype(jnp.float32)

    kernel = functools.partial(_ffn_kernel, p=p, training=training, tm=tm, C=C)

    cost = pl.CostEstimate(
        flops=4 * M * C * H,               # two matmuls, 2*M*C*H each
        transcendentals=0,
        bytes_accessed=(M * C * 2           # x (bf16)
                        + 2 * C * H * 2     # w1 + w2 (bf16)
                        + (H + C) * 4       # biases (f32)
                        + M * C * 4))       # output (f32)

    out = pl.pallas_call(
        kernel,
        out_shape=jax.ShapeDtypeStruct((M, C), x.dtype),
        grid_spec=pltpu.PrefetchScalarGridSpec(
            num_scalar_prefetch=1,
            grid=(M // tm,),
            in_specs=[
                pl.BlockSpec((tm, C), lambda i, s: (i, 0)),   # x tile
                pl.BlockSpec((C, H), lambda i, s: (0, 0)),    # w1 (resident)
                pl.BlockSpec((1, H), lambda i, s: (0, 0)),    # b1
                pl.BlockSpec((H, C), lambda i, s: (0, 0)),    # w2 (resident)
                pl.BlockSpec((1, C), lambda i, s: (0, 0)),    # b2
            ],
            out_specs=pl.BlockSpec((tm, C), lambda i, s: (i, 0)),
        ),
        compiler_params=pltpu.CompilerParams(
            dimension_semantics=("parallel",)),
        cost_estimate=cost,
    )(seed, x2, w1b, b1f, w2b, b2f)

    return out.reshape(B, T, C)


def init_params(key, n_embd):
    """PyTorch nn.Linear-style init (uniform +-1/sqrt(fan_in))."""
    h = 4 * n_embd
    k1, k2, k3, k4 = jax.random.split(key, 4)
    lim1 = 1.0 / jnp.sqrt(n_embd)
    lim2 = 1.0 / jnp.sqrt(h)
    w1 = jax.random.uniform(k1, (n_embd, h), jnp.float32, -lim1, lim1)
    b1 = jax.random.uniform(k2, (1, h), jnp.float32, -lim1, lim1)
    w2 = jax.random.uniform(k3, (h, n_embd), jnp.float32, -lim2, lim2)
    b2 = jax.random.uniform(k4, (1, n_embd), jnp.float32, -lim2, lim2)
    return w1, b1, w2, b2


if __name__ == "__main__":
    key = jax.random.PRNGKey(0)
    kx, kp = jax.random.split(key)

    B, T, C = 2, 8, N_EMBD
    x = jax.random.normal(kx, (B, T, C), jnp.float32)
    w1, b1, w2, b2 = init_params(kp, C)
    seed = jnp.array([0], dtype=jnp.int32)

    # Training path (dropout active).
    y_train = feedforward(x, w1, b1, w2, b2, seed, p=DROPOUT_P, training=True)
    jax.block_until_ready(y_train)
    assert y_train.shape == (B, T, C)
    assert bool(jnp.all(jnp.isfinite(y_train)))

    # Eval path (deterministic) vs plain-JAX reference with matching bf16 inputs.
    y_eval = feedforward(x, w1, b1, w2, b2, seed, p=DROPOUT_P, training=False)
    x2 = x.reshape(-1, C)
    h_ref = jnp.dot(x2.astype(jnp.bfloat16), w1.astype(jnp.bfloat16),
                    preferred_element_type=jnp.float32) + b1
    h_ref = jnp.maximum(h_ref, 0.0)
    ref = jnp.dot(h_ref.astype(jnp.bfloat16), w2.astype(jnp.bfloat16),
                  preferred_element_type=jnp.float32) + b2
    assert jnp.allclose(y_eval.reshape(-1, C), ref, atol=2e-2, rtol=2e-2)

    print("KERNEL_OK")
</pallas_src>

<mosaic_0001>
module attributes {stable_mosaic.version = 11 : i64} {
  func.func @_ffn_kernel(%arg0: i32, %arg1: memref<1xi32, #tpu.memory_space<smem>>, %arg2: memref<16x256xbf16, #tpu.memory_space<vmem>>, %arg3: memref<256x1024xbf16, #tpu.memory_space<vmem>>, %arg4: memref<1x1024xf32, #tpu.memory_space<vmem>>, %arg5: memref<1024x256xbf16, #tpu.memory_space<vmem>>, %arg6: memref<1x256xf32, #tpu.memory_space<vmem>>, %arg7: memref<16x256xf32, #tpu.memory_space<vmem>>) attributes {dimension_semantics = [#tpu.dimension_semantics<parallel>], iteration_bounds = array<i64: 1>, scalar_prefetch = 1 : i64, scratch_operands = 0 : i64, tpu.core_type = #tpu.core_type<tc>, window_params = [{transform_indices = @transform_0, window_bounds = array<i64: 16, 256>}, {pipeline_mode = #tpu.pipeline_mode<synchronous>, transform_indices = @transform_1, window_bounds = array<i64: 256, 1024>}, {pipeline_mode = #tpu.pipeline_mode<synchronous>, transform_indices = @transform_2, window_bounds = array<i64: 1, 1024>}, {pipeline_mode = #tpu.pipeline_mode<synchronous>, transform_indices = @transform_3, window_bounds = array<i64: 1024, 256>}, {pipeline_mode = #tpu.pipeline_mode<synchronous>, transform_indices = @transform_4, window_bounds = array<i64: 1, 256>}, {transform_indices = @transform_5, window_bounds = array<i64: 16, 256>}]} {
    %c0 = arith.constant 0 : index
    %c0_0 = arith.constant 0 : index
    %0 = vector.load %arg2[%c0, %c0_0] : memref<16x256xbf16, #tpu.memory_space<vmem>>, vector<16x256xbf16>
    %c0_1 = arith.constant 0 : index
    %c0_2 = arith.constant 0 : index
    %1 = vector.load %arg3[%c0_1, %c0_2] : memref<256x1024xbf16, #tpu.memory_space<vmem>>, vector<256x1024xbf16>
    %cst = arith.constant dense<0.000000e+00> : vector<16x1024xf32>
    %2 = tpu.matmul %0, %1, %cst {dimension_numbers = #tpu.dot_dimension_numbers<[1], [0], [0], [1], [0, 0, 1, 1], [], []>} : vector<16x256xbf16>, vector<256x1024xbf16>, vector<16x1024xf32> -> vector<16x1024xf32>
    %c0_3 = arith.constant 0 : index
    %c0_4 = arith.constant 0 : index
    %3 = vector.load %arg4[%c0_3, %c0_4] : memref<1x1024xf32, #tpu.memory_space<vmem>>, vector<1x1024xf32>
    %4 = vector.broadcast %3 : vector<1x1024xf32> to vector<16x1024xf32>
    %5 = arith.addf %2, %4 : vector<16x1024xf32>
    %cst_5 = arith.constant 0.000000e+00 : f32
    %6 = vector.broadcast %cst_5 : f32 to vector<16x1024xf32>
    %7 = arith.maximumf %5, %6 : vector<16x1024xf32>
    %8 = arith.truncf %7 : vector<16x1024xf32> to vector<16x1024xbf16>
    %c0_6 = arith.constant 0 : index
    %c0_7 = arith.constant 0 : index
    %9 = vector.load %arg5[%c0_6, %c0_7] : memref<1024x256xbf16, #tpu.memory_space<vmem>>, vector<1024x256xbf16>
    %cst_8 = arith.constant dense<0.000000e+00> : vector<16x256xf32>
    %10 = tpu.matmul %8, %9, %cst_8 {dimension_numbers = #tpu.dot_dimension_numbers<[1], [0], [0], [1], [0, 0, 1, 1], [], []>} : vector<16x1024xbf16>, vector<1024x256xbf16>, vector<16x256xf32> -> vector<16x256xf32>
    %c0_9 = arith.constant 0 : index
    %c0_10 = arith.constant 0 : index
    %11 = vector.load %arg6[%c0_9, %c0_10] : memref<1x256xf32, #tpu.memory_space<vmem>>, vector<1x256xf32>
    %12 = vector.broadcast %11 : vector<1x256xf32> to vector<16x256xf32>
    %13 = arith.addf %10, %12 : vector<16x256xf32>
    %c16_i32 = arith.constant 16 : i32
    %14 = arith.muli %arg0, %c16_i32 : i32
    %15 = tpu.iota {dimensions = array<i32: 0>} : vector<16x256xi32>
    %16 = vector.broadcast %14 : i32 to vector<16x256xi32>
    %17 = arith.addi %15, %16 : vector<16x256xi32>
    %18 = tpu.iota {dimensions = array<i32: 1>} : vector<16x256xi32>
    %c256_i32 = arith.constant 256 : i32
    %19 = vector.broadcast %c256_i32 : i32 to vector<16x256xi32>
    %20 = arith.muli %17, %19 : vector<16x256xi32>
    %21 = arith.addi %20, %18 : vector<16x256xi32>
    %c-1640531527_i32 = arith.constant -1640531527 : i32
    %22 = vector.broadcast %c-1640531527_i32 : i32 to vector<16x256xi32>
    %23 = arith.muli %21, %22 : vector<16x256xi32>
    %c0_11 = arith.constant 0 : index
    %24 = memref.load %arg1[%c0_11] : memref<1xi32, #tpu.memory_space<smem>>
    %25 = vector.broadcast %24 : i32 to vector<16x256xi32>
    %26 = arith.addi %23, %25 : vector<16x256xi32>
    %c2147483647_i32 = arith.constant 2147483647 : i32
    %27 = vector.broadcast %c2147483647_i32 : i32 to vector<16x256xi32>
    %28 = arith.andi %26, %27 : vector<16x256xi32>
    %c16_i32_12 = arith.constant 16 : i32
    %29 = vector.broadcast %c16_i32_12 : i32 to vector<16x256xi32>
    %30 = arith.shrsi %28, %29 : vector<16x256xi32>
    %31 = arith.xori %26, %30 : vector<16x256xi32>
    %c-2048144789_i32 = arith.constant -2048144789 : i32
    %32 = vector.broadcast %c-2048144789_i32 : i32 to vector<16x256xi32>
    %33 = arith.muli %31, %32 : vector<16x256xi32>
    %c2147483647_i32_13 = arith.constant 2147483647 : i32
    %34 = vector.broadcast %c2147483647_i32_13 : i32 to vector<16x256xi32>
    %35 = arith.andi %33, %34 : vector<16x256xi32>
    %c13_i32 = arith.constant 13 : i32
    %36 = vector.broadcast %c13_i32 : i32 to vector<16x256xi32>
    %37 = arith.shrsi %35, %36 : vector<16x256xi32>
    %38 = arith.xori %33, %37 : vector<16x256xi32>
    %c-1028477387_i32 = arith.constant -1028477387 : i32
    %39 = vector.broadcast %c-1028477387_i32 : i32 to vector<16x256xi32>
    %40 = arith.muli %38, %39 : vector<16x256xi32>
    %c2147483647_i32_14 = arith.constant 2147483647 : i32
    %41 = vector.broadcast %c2147483647_i32_14 : i32 to vector<16x256xi32>
    %42 = arith.andi %40, %41 : vector<16x256xi32>
    %c16_i32_15 = arith.constant 16 : i32
    %43 = vector.broadcast %c16_i32_15 : i32 to vector<16x256xi32>
    %44 = arith.shrsi %42, %43 : vector<16x256xi32>
    %45 = arith.xori %40, %44 : vector<16x256xi32>
    %c8388607_i32 = arith.constant 8388607 : i32
    %46 = vector.broadcast %c8388607_i32 : i32 to vector<16x256xi32>
    %47 = arith.andi %45, %46 : vector<16x256xi32>
    %48 = arith.sitofp %47 : vector<16x256xi32> to vector<16x256xf32>
    %cst_16 = arith.constant 1.1920929E-7 : f32
    %49 = vector.broadcast %cst_16 : f32 to vector<16x256xf32>
    %50 = arith.mulf %48, %49 : vector<16x256xf32>
    %cst_17 = arith.constant 2.000000e-01 : f32
    %51 = vector.broadcast %cst_17 : f32 to vector<16x256xf32>
    %52 = arith.cmpf oge, %50, %51 : vector<16x256xf32>
    %cst_18 = arith.constant 1.250000e+00 : f32
    %cst_19 = arith.constant 0.000000e+00 : f32
    %53 = vector.broadcast %cst_18 : f32 to vector<16x256xf32>
    %54 = vector.broadcast %cst_19 : f32 to vector<16x256xf32>
    %55 = arith.select %52, %53, %54 : vector<16x256xi1>, vector<16x256xf32>
    %56 = arith.mulf %13, %55 : vector<16x256xf32>
    %c0_20 = arith.constant 0 : index
    %c0_21 = arith.constant 0 : index
    %57 = vector.load %arg7[%c0_20, %c0_21] : memref<16x256xf32, #tpu.memory_space<vmem>>, vector<16x256xf32>
    tpu.vector_store %arg7[%c0_20, %c0_21], %56 {strides = array<i32>} : memref<16x256xf32, #tpu.memory_space<vmem>>, vector<16x256xf32>,
    return
  }
  func.func @transform_0(%arg0: i32, %arg1: memref<1xi32, #tpu.memory_space<smem>>) -> (i32, i32) {
    %c0_i32 = arith.constant 0 : i32
    %c0_i32_0 = arith.constant 0 : i32
    return %arg0, %c0_i32 : i32, i32
  }
  func.func @transform_1(%arg0: i32, %arg1: memref<1xi32, #tpu.memory_space<smem>>) -> (i32, i32) {
    %c0_i32 = arith.constant 0 : i32
    %c0_i32_0 = arith.constant 0 : i32
    %c0_i32_1 = arith.constant 0 : i32
    return %c0_i32, %c0_i32_0 : i32, i32
  }
  func.func @transform_2(%arg0: i32, %arg1: memref<1xi32, #tpu.memory_space<smem>>) -> (i32, i32) {
    %c0_i32 = arith.constant 0 : i32
    %c0_i32_0 = arith.constant 0 : i32
    %c0_i32_1 = arith.constant 0 : i32
    return %c0_i32, %c0_i32_0 : i32, i32
  }
  func.func @transform_3(%arg0: i32, %arg1: memref<1xi32, #tpu.memory_space<smem>>) -> (i32, i32) {
    %c0_i32 = arith.constant 0 : i32
    %c0_i32_0 = arith.constant 0 : i32
    %c0_i32_1 = arith.constant 0 : i32
    return %c0_i32, %c0_i32_0 : i32, i32
  }
  func.func @transform_4(%arg0: i32, %arg1: memref<1xi32, #tpu.memory_space<smem>>) -> (i32, i32) {
    %c0_i32 = arith.constant 0 : i32
    %c0_i32_0 = arith.constant 0 : i32
    %c0_i32_1 = arith.constant 0 : i32
    return %c0_i32, %c0_i32_0 : i32, i32
  }
  func.func @transform_5(%arg0: i32, %arg1: memref<1xi32, #tpu.memory_space<smem>>) -> (i32, i32) {
    %c0_i32 = arith.constant 0 : i32
    %c0_i32_0 = arith.constant 0 : i32
    return %arg0, %c0_i32 : i32, i32
  }
}

</mosaic_0001>

<bundles_post_ra>
// kernel: tpu_custom_call.1
= control target key start
LH: loop header
LB: loop body
LE: loop exit
PB: predicated region body
PF: predicated region fallthrough
CT: control target
= control target key end

     0   :  { %12 = vsyncpa [#allocation5], 0  ;;  %s2848_s0 = inlined_call_operand.<no memory space> [shape: s32[1], index: 0, kind: input, shape index: {}]   ;;  %s2849_s1 = inlined_call_operand.hbm [shape: bf16[16,256], index: 1, kind: input, shape index: {}]   ;;  %s2850_s2 = inlined_call_operand.hbm [shape: bf16[256,1024], index: 2, kind: input, shape index: {}]   ;;  %s2851_s3 = inlined_call_operand.hbm [shape: f32[1,1024], index: 3, kind: input, shape index: {}]   ;;  %s2852_s4 = inlined_call_operand.hbm [shape: bf16[1024,256], index: 4, kind: input, shape index: {}]   ;;  %s2853_s5 = inlined_call_operand.vmem [shape: f32[1,256], index: 5, kind: input, shape index: {}]   ;;  %s2854_s6 = inlined_call_operand.hbm [shape: f32[16,256], index: 6, kind: output, shape index: {}]  }
   0x1   :  { %13 = vsyncpa [#allocation8], 0 }
   0x2   :  { %14 = vsyncpa [#allocation11], 0 }
   0x3   :  { %15 = vsyncpa [#allocation6], 0  ;;  %s2736_s21 = smov [#allocation7]  }
   0x4   :  { %s33_s22 = sshll.u32 %s2736_s21, 4  ;;  %s34_s22 = int_to_ptr.vmem [resolvable:$true] %s33_s22 }
   0x5   :  { %s2636_s23 = scalar_lea.vmem %s34_s22, 16384  ;;  %p2641_p1 = scmp.lt.s32.totalorder %s34_s22, %s34_s22 }
   0x6   :  { %p2637_p0 = scmp.ne.s32.totalorder %s34_s22, %s2636_s23  ;;  %p2642_p2 = scmp.lt.s32.totalorder %s2636_s23, %s2636_s23 }
   0x8   :  { %p2643_p3 = por %p2642_p2, %p2641_p1 }
   0xa   :  { %p2644_p4 = pnand %p2643_p3, %p2637_p0 }
   0xc   :  { %2647 = shalt.err (!%p2644_p4)
}
   0xd   :  { %s2737_s24 = smov 512   ;;  %s2738_s25 = smov 32  }
   0xe   :  { %39 = dma.hbm_to_vmem [thread:$0]  %s2850_s2, 16384, %s34_s22, [#allocation8], %s2737_s24, %s2737_s24, %s2738_s25  }
   0xf   :  { %s2739_s28 = smov [#allocation4]  }
  0x10   :  { %s21_s29 = sshll.u32 %s2739_s28, 4  ;;  %s22_s29 = int_to_ptr.vmem [resolvable:$true] %s21_s29 }
  0x11   :  { %s2656_s30 = scalar_lea.vmem %s22_s29, 256  ;;  %p2661_p6 = scmp.lt.s32.totalorder %s22_s29, %s22_s29 }
  0x12   :  { %p2657_p5 = scmp.ne.s32.totalorder %s22_s29, %s2656_s30  ;;  %p2662_p7 = scmp.lt.s32.totalorder %s2656_s30, %s2656_s30 }
  0x14   :  { %p2663_p8 = por %p2662_p7, %p2661_p6 }
  0x16   :  { %p2664_p9 = pnand %p2663_p8, %p2657_p5 }
  0x18   :  { %2667 = shalt.err (!%p2664_p9)
}
  0x19   :  { %s2740_s7 = smov 128   ;;  %s2741_s8 = smov 8  }
  0x1a   :  { %27 = dma.hbm_to_vmem [thread:$0]  %s2849_s1, 256, %s22_s29, [#allocation5], %s2740_s7, %s2740_s7, %s2741_s8  }
  0x1b   :  { %s2742_s11 = smov [#allocation9]   ;;  %s2743_s13 = smov [#allocation10]  }
  0x1c   :  { %s46_s12 = sshll.u32 %s2742_s11, 4  ;;  %s55_s2 = sshll.u32 %s2743_s13, 4  ;;  %s47_s12 = int_to_ptr.vmem [resolvable:$true] %s46_s12  ;;  %s56_s2 = int_to_ptr.vmem [resolvable:$true] %s55_s2 }
  0x1d   :  { %s2676_s14 = scalar_lea.vmem %s47_s12, 128  ;;  %p2681_p11 = scmp.lt.s32.totalorder %s47_s12, %s47_s12 }
  0x1e   :  { %p2677_p10 = scmp.ne.s32.totalorder %s47_s12, %s2676_s14  ;;  %p2682_p12 = scmp.lt.s32.totalorder %s2676_s14, %s2676_s14 }
  0x20   :  { %p2683_p13 = por %p2682_p12, %p2681_p11 }
  0x22   :  { %p2684_p0 = pnand %p2683_p13, %p2677_p10 }
  0x24   :  { %2687 = shalt.err (!%p2684_p0)
}
  0x25   :  { %49 = dma.hbm_to_vmem [thread:$0]  %s2851_s3, 128, %s47_s12, [#allocation8]  }
  0x26   :  { %s2696_s17 = scalar_lea.vmem %s56_s2, 16384  ;;  %p2701_p2 = scmp.lt.s32.totalorder %s56_s2, %s56_s2 }
  0x27   :  { %p2697_p1 = scmp.ne.s32.totalorder %s56_s2, %s2696_s17  ;;  %p2702_p3 = scmp.lt.s32.totalorder %s2696_s17, %s2696_s17 }
  0x29   :  { %p2703_p4 = por %p2702_p3, %p2701_p2 }
  0x2b   :  { %p2704_p5 = pnand %p2703_p4, %p2697_p1 }
  0x2d   :  { %2707 = shalt.err (!%p2704_p5)
}
  0x2e   :  { %61 = dma.hbm_to_vmem [thread:$0]  %s2852_s4, 16384, %s56_s2, [#allocation11], %s2740_s7, %s2740_s7, %s2741_s8  }
  0x2f   :  { %2728 = dma.done.wait [#allocation5], 256  }
  0x30   :  { %2729 = vsyncadd [#allocation5], 4294967040 }
  0x31   :  { %2730 = dma.done.wait [#allocation8], 16512  }
  0x32   :  { %2731 = vsyncadd [#allocation8], 4294950784 }
  0x33   :  { %2732 = dma.done.wait [#allocation11], 16384  }
  0x34   :  { %2733 = vsyncadd [#allocation11], 4294950912  ;;  %v134_v0 = vld [vmem:[#allocation7 + $0x1c0] sm:$0xff]  ;;  %v135_v2 = vld [vmem:[#allocation7 + $0x1c8] sm:$0xff] }
  0x35   :  { %v138_v1 = vld [vmem:[#allocation7 + $0x1e0] sm:$0xff]  ;;  %v139_v4 = vld [vmem:[#allocation7 + $0x1e8] sm:$0xff]  ;;  %v2795_v56 = vld [vmem:[#allocation4 + $0x4] ss:$8 sps:$4 sm:$0xff]  }
  0x36   :  { %v2222_v3 = vcombine.high %v134_v0, %v138_v1  ;;  %v2221_v5 = vcombine.low %v134_v0, %v138_v1  ;;  %v126_v6 = vld [vmem:[#allocation7 + $0x180] sm:$0xff]  ;;  %v2224_v8 = vcombine.high %v135_v2, %v139_v4  ;;  %v2223_v9 = vcombine.low %v135_v2, %v139_v4  ;;  %v127_v11 = vld [vmem:[#allocation7 + $0x188] sm:$0xff]  ;;  %930 = vmatprep.mubr.bf16.mxu0 %v2795_v56 }
  0x37   :  { %v130_v7 = vld [vmem:[#allocation7 + $0x1a0] sm:$0xff]  ;;  %v131_v12 = vld [vmem:[#allocation7 + $0x1a8] sm:$0xff]  ;;  %973 = vmatprep.mubr.bf16.mxu1 %v2795_v56 }
  0x38   :  { %v2214_v10 = vcombine.high %v126_v6, %v130_v7  ;;  %v118_v13 = vld [vmem:[#allocation7 + $0x140] sm:$0xff]  ;;  %898 = vmatprep.subr.bf16.mxu0 %v2222_v3  ;;  %v2216_v14 = vcombine.high %v127_v11, %v131_v12  ;;  %v119_v16 = vld [vmem:[#allocation7 + $0x148] sm:$0xff]  ;;  %941 = vmatprep.subr.bf16.mxu1 %v2224_v8  ;;  %v2213_v18 = vcombine.low %v126_v6, %v130_v7 }
  0x39   :  { %v122_v15 = vld [vmem:[#allocation7 + $0x160] sm:$0xff]  ;;  %v123_v17 = vld [vmem:[#allocation7 + $0x168] sm:$0xff]  ;;  %899 = vmatpush1.bf16.msra.mxu0 %v2221_v5  ;;  %942 = vmatpush1.bf16.msra.mxu1 %v2223_v9  ;;  %v2215_v19 = vcombine.low %v127_v11, %v131_v12 }
  0x3a   :  { %900 = vmatprep.subr.bf16.mxu0 %v2214_v10  ;;  %v2206_v20 = vcombine.high %v118_v13, %v122_v15  ;;  %943 = vmatprep.subr.bf16.mxu1 %v2216_v14  ;;  %v2208_v21 = vcombine.high %v119_v16, %v123_v17  ;;  %v110_v22 = vld [vmem:[#allocation7 + $0x100] sm:$0xff]  ;;  %v111_v24 = vld [vmem:[#allocation7 + $0x108] sm:$0xff]  ;;  %v2205_v26 = vcombine.low %v118_v13, %v122_v15 }
  0x3b   :  { %v114_v23 = vld [vmem:[#allocation7 + $0x120] sm:$0xff]  ;;  %v115_v25 = vld [vmem:[#allocation7 + $0x128] sm:$0xff]  ;;  %v2207_v27 = vcombine.low %v119_v16, %v123_v17 }
  0x3c   :  { %v2198_v28 = vcombine.high %v110_v22, %v114_v23  ;;  %v2200_v29 = vcombine.high %v111_v24, %v115_v25  ;;  %v102_v30 = vld [vmem:[#allocation7 + $0xc0] sm:$0xff]  ;;  %v103_v32 = vld [vmem:[#allocation7 + $0xc8] sm:$0xff]  ;;  %v2197_v34 = vcombine.low %v110_v22, %v114_v23  ;;  %v2199_v35 = vcombine.low %v111_v24, %v115_v25 }
  0x3d   :  { %901 = vmatpush1.bf16.msra.mxu0 %v2213_v18  ;;  %944 = vmatpush1.bf16.msra.mxu1 %v2215_v19  ;;  %v106_v31 = vld [vmem:[#allocation7 + $0xe0] sm:$0xff]  ;;  %v107_v33 = vld [vmem:[#allocation7 + $0xe8] sm:$0xff] }
  0x3e   :  { %902 = vmatprep.subr.bf16.mxu0 %v2206_v20  ;;  %945 = vmatprep.subr.bf16.mxu1 %v2208_v21  ;;  %v2190_v36 = vcombine.high %v102_v30, %v106_v31  ;;  %v2192_v37 = vcombine.high %v103_v32, %v107_v33  ;;  %v94_v38 = vld [vmem:[#allocation7 + $0x80] sm:$0xff]  ;;  %v95_v40 = vld [vmem:[#allocation7 + $0x88] sm:$0xff]  ;;  %v2189_v42 = vcombine.low %v102_v30, %v106_v31 }
  0x3f   :  { %v98_v39 = vld [vmem:[#allocation7 + $0xa0] sm:$0xff]  ;;  %v99_v41 = vld [vmem:[#allocation7 + $0xa8] sm:$0xff]  ;;  %v2191_v43 = vcombine.low %v103_v32, %v107_v33 }
  0x40   :  { %v2182_v44 = vcombine.high %v94_v38, %v98_v39  ;;  %v2184_v45 = vcombine.high %v95_v40, %v99_v41  ;;  %v86_v46 = vld [vmem:[#allocation7 + $0x40] sm:$0xff]  ;;  %v87_v48 = vld [vmem:[#allocation7 + $0x48] sm:$0xff]  ;;  %v2181_v50 = vcombine.low %v94_v38, %v98_v39  ;;  %v2183_v51 = vcombine.low %v95_v40, %v99_v41 }
  0x41   :  { %903 = vmatpush1.bf16.msra.mxu0 %v2205_v26  ;;  %946 = vmatpush1.bf16.msra.mxu1 %v2207_v27  ;;  %v90_v47 = vld [vmem:[#allocation7 + $0x60] sm:$0xff]  ;;  %v91_v49 = vld [vmem:[#allocation7 + $0x68] sm:$0xff] }
  0x42   :  { %904 = vmatprep.subr.bf16.mxu0 %v2198_v28  ;;  %947 = vmatprep.subr.bf16.mxu1 %v2200_v29  ;;  %v2174_v52 = vcombine.high %v86_v46, %v90_v47  ;;  %v2176_v53 = vcombine.high %v87_v48, %v91_v49  ;;  %v78_v54 = vld [vmem:[#allocation7] sm:$0xff]  ;;  %v79_v57 = vld [vmem:[#allocation7 + $0x8] sm:$0xff]  ;;  %v2173_v59 = vcombine.low %v86_v46, %v90_v47 }
  0x43   :  { %v82_v55 = vld [vmem:[#allocation7 + $0x20] sm:$0xff]  ;;  %v83_v58 = vld [vmem:[#allocation7 + $0x28] sm:$0xff]  ;;  %v2175_v60 = vcombine.low %v87_v48, %v91_v49 }
  0x44   :  { %v2166_v61 = vcombine.high %v78_v54, %v82_v55  ;;  %v2168_v62 = vcombine.high %v79_v57, %v83_v58  ;;  %v198_v63 = vld [vmem:[#allocation7 + $0x3c0] sm:$0xff]  ;;  %v199_v1 = vld [vmem:[#allocation7 + $0x3c8] sm:$0xff]  ;;  %v2165_v3 = vcombine.low %v78_v54, %v82_v55  ;;  %v2167_v4 = vcombine.low %v79_v57, %v83_v58 }
  0x45   :  { %905 = vmatpush1.bf16.msra.mxu0 %v2197_v34  ;;  %948 = vmatpush1.bf16.msra.mxu1 %v2199_v35  ;;  %v202_v0 = vld [vmem:[#allocation7 + $0x3e0] sm:$0xff]  ;;  %v203_v2 = vld [vmem:[#allocation7 + $0x3e8] sm:$0xff] }
  0x46   :  { %906 = vmatprep.subr.bf16.mxu0 %v2190_v36  ;;  %949 = vmatprep.subr.bf16.mxu1 %v2192_v37  ;;  %v2286_v5 = vcombine.high %v198_v63, %v202_v0  ;;  %v2288_v6 = vcombine.high %v199_v1, %v203_v2  ;;  %v190_v7 = vld [vmem:[#allocation7 + $0x380] sm:$0xff]  ;;  %v191_v9 = vld [vmem:[#allocation7 + $0x388] sm:$0xff]  ;;  %v2285_v11 = vcombine.low %v198_v63, %v202_v0  ;;  %v136_v0 = vld [vmem:[#allocation7 + $0x1d0] sm:$0xff] }
  0x47   :  { %v194_v8 = vld [vmem:[#allocation7 + $0x3a0] sm:$0xff]  ;;  %v195_v10 = vld [vmem:[#allocation7 + $0x3a8] sm:$0xff]  ;;  %v2287_v12 = vcombine.low %v199_v1, %v203_v2  ;;  %v140_v1 = vld [vmem:[#allocation7 + $0x1f0] sm:$0xff] }
  0x48   :  { %v2278_v13 = vcombine.high %v190_v7, %v194_v8  ;;  %v2280_v14 = vcombine.high %v191_v9, %v195_v10  ;;  %v182_v15 = vld [vmem:[#allocation7 + $0x340] sm:$0xff]  ;;  %v183_v17 = vld [vmem:[#allocation7 + $0x348] sm:$0xff]  ;;  %v2277_v19 = vcombine.low %v190_v7, %v194_v8  ;;  %v2279_v20 = vcombine.low %v191_v9, %v195_v10  ;;  %v137_v2 = vld [vmem:[#allocation7 + $0x1d8] sm:$0xff] }
  0x49   :  { %907 = vmatpush1.bf16.msra.mxu0 %v2189_v42  ;;  %950 = vmatpush1.bf16.msra.mxu1 %v2191_v43  ;;  %v186_v16 = vld [vmem:[#allocation7 + $0x360] sm:$0xff]  ;;  %v187_v18 = vld [vmem:[#allocation7 + $0x368] sm:$0xff]  ;;  %v2226_v7 = vcombine.high %v136_v0, %v140_v1  ;;  %v128_v9 = vld [vmem:[#allocation7 + $0x190] sm:$0xff] }
  0x4a   :  { %908 = vmatprep.subr.bf16.mxu0 %v2182_v44  ;;  %951 = vmatprep.subr.bf16.mxu1 %v2184_v45  ;;  %v2270_v21 = vcombine.high %v182_v15, %v186_v16  ;;  %v2272_v22 = vcombine.high %v183_v17, %v187_v18  ;;  %v174_v23 = vld [vmem:[#allocation7 + $0x300] sm:$0xff]  ;;  %v175_v25 = vld [vmem:[#allocation7 + $0x308] sm:$0xff]  ;;  %v2269_v27 = vcombine.low %v182_v15, %v186_v16  ;;  %v132_v10 = vld [vmem:[#allocation7 + $0x1b0] sm:$0xff] }
  0x4b   :  { %v178_v24 = vld [vmem:[#allocation7 + $0x320] sm:$0xff]  ;;  %v179_v26 = vld [vmem:[#allocation7 + $0x328] sm:$0xff]  ;;  %v2271_v28 = vcombine.low %v183_v17, %v187_v18  ;;  %v2218_v15 = vcombine.high %v128_v9, %v132_v10  ;;  %v120_v17 = vld [vmem:[#allocation7 + $0x150] sm:$0xff] }
  0x4c   :  { %v2262_v29 = vcombine.high %v174_v23, %v178_v24  ;;  %v2264_v30 = vcombine.high %v175_v25, %v179_v26  ;;  %v166_v31 = vld [vmem:[#allocation7 + $0x2c0] sm:$0xff]  ;;  %v167_v33 = vld [vmem:[#allocation7 + $0x2c8] sm:$0xff]  ;;  %v2261_v35 = vcombine.low %v174_v23, %v178_v24  ;;  %v2263_v36 = vcombine.low %v175_v25, %v179_v26  ;;  %v124_v18 = vld [vmem:[#allocation7 + $0x170] sm:$0xff] }
  0x4d   :  { %909 = vmatpush1.bf16.msra.mxu0 %v2181_v50  ;;  %952 = vmatpush1.bf16.msra.mxu1 %v2183_v51  ;;  %v170_v32 = vld [vmem:[#allocation7 + $0x2e0] sm:$0xff]  ;;  %v171_v34 = vld [vmem:[#allocation7 + $0x2e8] sm:$0xff]  ;;  %v2210_v23 = vcombine.high %v120_v17, %v124_v18  ;;  %v112_v25 = vld [vmem:[#allocation7 + $0x110] sm:$0xff] }
  0x4e   :  { %910 = vmatprep.subr.bf16.mxu0 %v2174_v52  ;;  %953 = vmatprep.subr.bf16.mxu1 %v2176_v53  ;;  %v2254_v37 = vcombine.high %v166_v31, %v170_v32  ;;  %v2256_v38 = vcombine.high %v167_v33, %v171_v34  ;;  %v158_v39 = vld [vmem:[#allocation7 + $0x280] sm:$0xff]  ;;  %v159_v41 = vld [vmem:[#allocation7 + $0x288] sm:$0xff]  ;;  %v2253_v43 = vcombine.low %v166_v31, %v170_v32  ;;  %v116_v26 = vld [vmem:[#allocation7 + $0x130] sm:$0xff] }
  0x4f   :  { %v162_v40 = vld [vmem:[#allocation7 + $0x2a0] sm:$0xff]  ;;  %v163_v42 = vld [vmem:[#allocation7 + $0x2a8] sm:$0xff]  ;;  %v2255_v44 = vcombine.low %v167_v33, %v171_v34  ;;  %v2202_v31 = vcombine.high %v112_v25, %v116_v26  ;;  %v104_v33 = vld [vmem:[#allocation7 + $0xd0] sm:$0xff] }
  0x50   :  { %v2246_v45 = vcombine.high %v158_v39, %v162_v40  ;;  %v2248_v46 = vcombine.high %v159_v41, %v163_v42  ;;  %v150_v47 = vld [vmem:[#allocation7 + $0x240] sm:$0xff]  ;;  %v151_v49 = vld [vmem:[#allocation7 + $0x248] sm:$0xff]  ;;  %v2245_v51 = vcombine.low %v158_v39, %v162_v40  ;;  %v2247_v52 = vcombine.low %v159_v41, %v163_v42  ;;  %v108_v34 = vld [vmem:[#allocation7 + $0xf0] sm:$0xff] }
  0x51   :  { %911 = vmatpush1.bf16.msra.mxu0 %v2173_v59  ;;  %954 = vmatpush1.bf16.msra.mxu1 %v2175_v60  ;;  %v154_v48 = vld [vmem:[#allocation7 + $0x260] sm:$0xff]  ;;  %v155_v50 = vld [vmem:[#allocation7 + $0x268] sm:$0xff]  ;;  %v2194_v39 = vcombine.high %v104_v33, %v108_v34  ;;  %v96_v40 = vld [vmem:[#allocation7 + $0x90] sm:$0xff] }
  0x52   :  { %912 = vmatprep.subr.bf16.mxu0 %v2166_v61  ;;  %955 = vmatprep.subr.bf16.mxu1 %v2168_v62  ;;  %v2238_v53 = vcombine.high %v150_v47, %v154_v48  ;;  %v2240_v54 = vcombine.high %v151_v49, %v155_v50  ;;  %v142_v55 = vld [vmem:[#allocation7 + $0x200] sm:$0xff]  ;;  %v143_v58 = vld [vmem:[#allocation7 + $0x208] sm:$0xff]  ;;  %v2237_v60 = vcombine.low %v150_v47, %v154_v48  ;;  %v100_v41 = vld [vmem:[#allocation7 + $0xb0] sm:$0xff] }
  0x53   :  { %v146_v57 = vld [vmem:[#allocation7 + $0x220] sm:$0xff]  ;;  %v147_v59 = vld [vmem:[#allocation7 + $0x228] sm:$0xff]  ;;  %v2239_v61 = vcombine.low %v151_v49, %v155_v50  ;;  %v97_v42 = vld [vmem:[#allocation7 + $0x98] sm:$0xff]  ;;  %v2186_v48 = vcombine.high %v96_v40, %v100_v41 }
  0x54   :  { %v2230_v62 = vcombine.high %v142_v55, %v146_v57  ;;  %v2232_v63 = vcombine.high %v143_v58, %v147_v59  ;;  %v89_v49 = vld [vmem:[#allocation7 + $0x58] sm:$0xff] }
  0x55   :  { %913 = vmatpush1.bf16.msra.mxu0 %v2165_v3  ;;  %956 = vmatpush1.bf16.msra.mxu1 %v2167_v4  ;;  %v141_v3 = vld [vmem:[#allocation7 + $0x1f8] sm:$0xff]  ;;  %v2229_v4 = vcombine.low %v142_v55, %v146_v57 }
  0x56   :  { %914 = vmatprep.subr.bf16.mxu0 %v2286_v5  ;;  %957 = vmatprep.subr.bf16.mxu1 %v2288_v6  ;;  %v2231_v5 = vcombine.low %v143_v58, %v147_v59  ;;  %v2799_v6 = vld [vmem:[#allocation4] ss:$8 sps:$4 sm:$0xff]   ;;  %v2228_v8 = vcombine.high %v137_v2, %v141_v3 }
  0x57   :  { %v93_v50 = vld [vmem:[#allocation7 + $0x78] sm:$0xff] }
  0x58   :  { %v81_v58 = vld [vmem:[#allocation7 + $0x18] sm:$0xff] }
  0x59   :  { %915 = vmatpush2.bf16.msra.mxu0 %v2285_v11  ;;  %958 = vmatpush2.bf16.msra.mxu1 %v2287_v12  ;;  %v129_v11 = vld [vmem:[#allocation7 + $0x198] sm:$0xff] }
  0x5a   :  { %916 = vmatprep.subr.bf16.mxu0 %v2278_v13  ;;  %959 = vmatprep.subr.bf16.mxu1 %v2280_v14  ;;  %v133_v12 = vld [vmem:[#allocation7 + $0x1b8] sm:$0xff]  ;;  %v2225_v13 = vcombine.low %v136_v0, %v140_v1  ;;  %v2227_v14 = vcombine.low %v137_v2, %v141_v3  ;;  %v2179_v0 = vcombine.low %v89_v49, %v93_v50 }
  0x5b   :  { %v2220_v16 = vcombine.high %v129_v11, %v133_v12  ;;  %v85_v59 = vld [vmem:[#allocation7 + $0x38] sm:$0xff] }
  0x5c   :  { %v201_v2 = vld [vmem:[#allocation7 + $0x3d8] sm:$0xff] }
  0x5d   :  { %917 = vmatpush2.bf16.msra.mxu0 %v2277_v19  ;;  %960 = vmatpush2.bf16.msra.mxu1 %v2279_v20  ;;  %v121_v19 = vld [vmem:[#allocation7 + $0x158] sm:$0xff] }
  0x5e   :  { %918 = vmatprep.subr.bf16.mxu0 %v2270_v21  ;;  %961 = vmatprep.subr.bf16.mxu1 %v2272_v22  ;;  %v125_v20 = vld [vmem:[#allocation7 + $0x178] sm:$0xff]  ;;  %v2217_v21 = vcombine.low %v128_v9, %v132_v10  ;;  %v2219_v22 = vcombine.low %v129_v11, %v133_v12  ;;  %v2171_v9 = vcombine.low %v81_v58, %v85_v59 }
  0x5f   :  { %v2212_v24 = vcombine.high %v121_v19, %v125_v20  ;;  %v205_v3 = vld [vmem:[#allocation7 + $0x3f8] sm:$0xff] }
  0x60   :  { %v193_v11 = vld [vmem:[#allocation7 + $0x398] sm:$0xff] }
  0x61   :  { %919 = vmatpush2.bf16.msra.mxu0 %v2269_v27  ;;  %962 = vmatpush2.bf16.msra.mxu1 %v2271_v28  ;;  %v113_v27 = vld [vmem:[#allocation7 + $0x118] sm:$0xff] }
  0x62   :  { %920 = vmatprep.subr.bf16.mxu0 %v2262_v29  ;;  %963 = vmatprep.subr.bf16.mxu1 %v2264_v30  ;;  %v117_v28 = vld [vmem:[#allocation7 + $0x138] sm:$0xff]  ;;  %v2209_v29 = vcombine.low %v120_v17, %v124_v18  ;;  %v2211_v30 = vcombine.low %v121_v19, %v125_v20  ;;  %v2291_v17 = vcombine.low %v201_v2, %v205_v3 }
  0x63   :  { %v2204_v32 = vcombine.high %v113_v27, %v117_v28  ;;  %v197_v12 = vld [vmem:[#allocation7 + $0x3b8] sm:$0xff] }
  0x64   :  { %v185_v19 = vld [vmem:[#allocation7 + $0x358] sm:$0xff] }
  0x65   :  { %921 = vmatpush2.bf16.msra.mxu0 %v2261_v35  ;;  %964 = vmatpush2.bf16.msra.mxu1 %v2263_v36  ;;  %v105_v35 = vld [vmem:[#allocation7 + $0xd8] sm:$0xff] }
  0x66   :  { %922 = vmatprep.subr.bf16.mxu0 %v2254_v37  ;;  %965 = vmatprep.subr.bf16.mxu1 %v2256_v38  ;;  %v109_v36 = vld [vmem:[#allocation7 + $0xf8] sm:$0xff]  ;;  %v2201_v37 = vcombine.low %v112_v25, %v116_v26  ;;  %v2203_v38 = vcombine.low %v113_v27, %v117_v28  ;;  %v2283_v25 = vcombine.low %v193_v11, %v197_v12 }
  0x67   :  { %v2195_v47 = vcombine.low %v105_v35, %v109_v36  ;;  %v189_v20 = vld [vmem:[#allocation7 + $0x378] sm:$0xff] }
  0x68   :  { %v177_v27 = vld [vmem:[#allocation7 + $0x318] sm:$0xff] }
  0x69   :  { %923 = vmatpush2.bf16.msra.mxu0 %v2253_v43  ;;  %966 = vmatpush2.bf16.msra.mxu1 %v2255_v44  ;;  %v101_v43 = vld [vmem:[#allocation7 + $0xb8] sm:$0xff]  ;;  %v2193_v44 = vcombine.low %v104_v33, %v108_v34  ;;  %v168_v34 = vld [vmem:[#allocation7 + $0x2d0] sm:$0xff] }
  0x6a   :  { %924 = vmatprep.subr.bf16.mxu0 %v2246_v45  ;;  %967 = vmatprep.subr.bf16.mxu1 %v2248_v46  ;;  %v88_v45 = vld [vmem:[#allocation7 + $0x50] sm:$0xff]  ;;  %v2187_v55 = vcombine.low %v97_v42, %v101_v43  ;;  %v181_v28 = vld [vmem:[#allocation7 + $0x338] sm:$0xff] }
  0x6b   :  { %v92_v46 = vld [vmem:[#allocation7 + $0x70] sm:$0xff]  ;;  %v2268_v33 = vcombine.high %v177_v27, %v181_v28 }
  0x6c   :  { %v2178_v57 = vcombine.high %v88_v45, %v92_v46 }
  0x6d   :  { %925 = vmatpush2.bf16.msra.mxu0 %v2245_v51  ;;  %968 = vmatpush2.bf16.msra.mxu1 %v2247_v52  ;;  %v2188_v51 = vcombine.high %v97_v42, %v101_v43  ;;  %v2185_v52 = vcombine.low %v96_v40, %v100_v41  ;;  %v160_v41 = vld [vmem:[#allocation7 + $0x290] sm:$0xff]  ;;  %v161_v43 = vld [vmem:[#allocation7 + $0x298] sm:$0xff] }
  0x6e   :  { %926 = vmatprep.subr.bf16.mxu0 %v2238_v53  ;;  %969 = vmatprep.subr.bf16.mxu1 %v2240_v54  ;;  %v80_v53 = vld [vmem:[#allocation7 + $0x10] sm:$0xff] }
  0x6f   :  { %v84_v54 = vld [vmem:[#allocation7 + $0x30] sm:$0xff] }
  0x70   :  { %v2170_v1 = vcombine.high %v80_v53, %v84_v54  ;;  %v164_v42 = vld [vmem:[#allocation7 + $0x2b0] sm:$0xff] }
  0x71   :  { %927 = vmatpush2.bf16.msra.mxu0 %v2237_v60  ;;  %970 = vmatpush2.bf16.msra.mxu1 %v2239_v61  ;;  %v2180_v60 = vcombine.high %v89_v49, %v93_v50  ;;  %v2177_v61 = vcombine.low %v88_v45, %v92_v46  ;;  %v152_v49 = vld [vmem:[#allocation7 + $0x250] sm:$0xff] }
  0x72   :  { %928 = vmatprep.subr.bf16.mxu0 %v2230_v62  ;;  %971 = vmatprep.subr.bf16.mxu1 %v2232_v63  ;;  %v200_v62 = vld [vmem:[#allocation7 + $0x3d0] sm:$0xff] }
  0x73   :  { %v204_v63 = vld [vmem:[#allocation7 + $0x3f0] sm:$0xff] }
  0x74   :  { %v2290_v10 = vcombine.high %v200_v62, %v204_v63  ;;  %v156_v50 = vld [vmem:[#allocation7 + $0x270] sm:$0xff] }
  0x75   :  { %929 = vmatpush2.bf16.msra.mxu0 %v2229_v4  ;;  %972 = vmatpush2.bf16.msra.mxu1 %v2231_v5  ;;  %v2172_v4 = vcombine.high %v81_v58, %v85_v59  ;;  %v2169_v5 = vcombine.low %v80_v53, %v84_v54  ;;  %v2249_v53 = vcombine.low %v160_v41, %v164_v42  ;;  %v144_v58 = vld [vmem:[#allocation7 + $0x210] sm:$0xff] }
  0x76   :  { %984 = vmatprep.subr.bf16.mxu0 %v2226_v7  ;;  %1027 = vmatprep.subr.bf16.mxu1 %v2228_v8  ;;  %v192_v7 = vld [vmem:[#allocation7 + $0x390] sm:$0xff] }
  0x77   :  { %v196_v8 = vld [vmem:[#allocation7 + $0x3b0] sm:$0xff] }
  0x78   :  { %931 = vmatmul.mubr.bf16.vlgmr.msra.gmra.mxu0 %v2799_v6  ;;  %974 = vmatmul.mubr.bf16.vlgmr.msra.gmra.mxu1 %v2799_v6  ;;  %v2282_v18 = vcombine.high %v192_v7, %v196_v8  ;;  %v148_v59 = vld [vmem:[#allocation7 + $0x230] sm:$0xff] }
  0x79   :  { %985 = vmatpush1.bf16.msra.mxu0 %v2225_v13  ;;  %1028 = vmatpush1.bf16.msra.mxu1 %v2227_v14  ;;  %v2292_v13 = vcombine.high %v201_v2, %v205_v3  ;;  %v2289_v14 = vcombine.low %v200_v62, %v204_v63  ;;  %v2241_v62 = vcombine.low %v152_v49, %v156_v50 }
  0x7a   :  { %986 = vmatprep.subr.bf16.mxu0 %v2218_v15  ;;  %1029 = vmatprep.subr.bf16.mxu1 %v2220_v16  ;;  %v184_v15 = vld [vmem:[#allocation7 + $0x350] sm:$0xff]  ;;  %v2233_v2 = vcombine.low %v144_v58, %v148_v59 }
  0x7b   :  { %1016 = vmatprep.mubr.bf16.mxu0 %v2795_v56  ;;  %1059 = vmatprep.mubr.bf16.mxu1 %v2795_v56  ;;  %v2196_v56 = vcombine.high %v105_v35, %v109_v36  ;;  %v188_v16 = vld [vmem:[#allocation7 + $0x370] sm:$0xff]  ;;  %v169_v36 = vld [vmem:[#allocation7 + $0x2d8] sm:$0xff] }
  0x7c   :  { %v2274_v26 = vcombine.high %v184_v15, %v188_v16  ;;  %v172_v35 = vld [vmem:[#allocation7 + $0x2f0] sm:$0xff] }
  0x7d   :  { %987 = vmatpush1.bf16.msra.mxu0 %v2217_v21  ;;  %1030 = vmatpush1.bf16.msra.mxu1 %v2219_v22  ;;  %v2284_v21 = vcombine.high %v193_v11, %v197_v12  ;;  %v2281_v22 = vcombine.low %v192_v7, %v196_v8  ;;  %v2258_v40 = vcombine.high %v168_v34, %v172_v35  ;;  %v2436_v7 = vld [vmem:[#allocation10 + $0x70] ss:$8 sps:$4 sm:$0xff]   ;;  %v2442_v11 = vld [vmem:[#allocation10 + $0x60] ss:$8 sps:$4 sm:$0xff]  }
  0x7e   :  { %988 = vmatprep.subr.bf16.mxu0 %v2210_v23  ;;  %1031 = vmatprep.subr.bf16.mxu1 %v2212_v24  ;;  %v176_v23 = vld [vmem:[#allocation7 + $0x310] sm:$0xff]  ;;  %v2257_v45 = vcombine.low %v168_v34, %v172_v35  ;;  %v2439_v8 = vld [vmem:[#allocation10 + $0x170] ss:$8 sps:$4 sm:$0xff]  }
  0x7f   :  { %v180_v24 = vld [vmem:[#allocation7 + $0x330] sm:$0xff] }
  0x80   :  { %v2445_v12 = vld [vmem:[#allocation10 + $0x160] ss:$8 sps:$4 sm:$0xff]  }
  0x81   :  { %989 = vmatpush1.bf16.msra.mxu0 %v2209_v29  ;;  %1032 = vmatpush1.bf16.msra.mxu1 %v2211_v30  ;;  %v2276_v29 = vcombine.high %v185_v19, %v189_v20  ;;  %v2273_v30 = vcombine.low %v184_v15, %v188_v16  ;;  %v2448_v15 = vld [vmem:[#allocation10 + $0x50] ss:$8 sps:$4 sm:$0xff]   ;;  %v2478_v34 = vld [vmem:[#allocation10] ss:$8 sps:$4 sm:$0xff]  }
  0x82   :  { %990 = vmatprep.subr.bf16.mxu0 %v2202_v31  ;;  %1033 = vmatprep.subr.bf16.mxu1 %v2204_v32  ;;  %v2275_v31 = vcombine.low %v185_v19, %v189_v20  ;;  %v2266_v32 = vcombine.high %v176_v23, %v180_v24  ;;  %v2451_v16 = vld [vmem:[#allocation10 + $0x150] ss:$8 sps:$4 sm:$0xff]   ;;  %v2454_v19 = vld [vmem:[#allocation10 + $0x40] ss:$8 sps:$4 sm:$0xff]   ;;  %v2462_v20 = vld [vmem:[#allocation10 + $0x34] ss:$8 sps:$4 sm:$0xff]  }
  0x83   :  { %v2481_v35 = vld [vmem:[#allocation10 + $0x100] ss:$8 sps:$4 sm:$0xff]  }
  0x85   :  { %991 = vmatpush1.bf16.msra.mxu0 %v2201_v37  ;;  %1034 = vmatpush1.bf16.msra.mxu1 %v2203_v38  ;;  %v173_v37 = vld [vmem:[#allocation7 + $0x2f8] sm:$0xff]  ;;  %v2265_v38 = vcombine.low %v176_v23, %v180_v24  ;;  %v2468_v24 = vld [vmem:[#allocation10 + $0x24] ss:$8 sps:$4 sm:$0xff]  }
  0x86   :  { %992 = vmatprep.subr.bf16.mxu0 %v2194_v39  ;;  %1035 = vmatprep.subr.bf16.mxu1 %v2196_v56  ;;  %v2267_v39 = vcombine.low %v177_v27, %v181_v28  ;;  %v2260_v56 = vcombine.high %v169_v36, %v173_v37  ;;  %v2259_v46 = vcombine.low %v169_v36, %v173_v37  ;;  %v2463_v23 = vld [vmem:[#allocation10 + $0x130] ss:$8 sps:$4 sm:$0xff]   ;;  %v2469_v27 = vld [vmem:[#allocation10 + $0x120] ss:$8 sps:$4 sm:$0xff]   ;;  %v2474_v28 = vld [vmem:[#allocation10 + $0x14] ss:$8 sps:$4 sm:$0xff]  }
  0x87   :  { %v2486_v36 = vld [vmem:[#allocation10 + $0xf4] ss:$8 sps:$4 sm:$0xff]  }
  0x88   :  { %v2489_v37 = vld [vmem:[#allocation10 + $0x1f4] ss:$8 sps:$4 sm:$0xff]  }
  0x89   :  { %993 = vmatpush1.bf16.msra.mxu0 %v2193_v44  ;;  %1036 = vmatpush1.bf16.msra.mxu1 %v2195_v47  ;;  %v165_v44 = vld [vmem:[#allocation7 + $0x2b8] sm:$0xff]  ;;  %v2250_v47 = vcombine.high %v160_v41, %v164_v42  ;;  %v2490_v41 = vld [vmem:[#allocation10 + $0xe0] ss:$8 sps:$4 sm:$0xff]  }
  0x8a   :  { %994 = vmatprep.subr.bf16.mxu0 %v2186_v48  ;;  %1037 = vmatprep.subr.bf16.mxu1 %v2188_v51  ;;  %v2252_v48 = vcombine.high %v161_v43, %v165_v44  ;;  %v153_v51 = vld [vmem:[#allocation7 + $0x258] sm:$0xff]  ;;  %v2251_v54 = vcombine.low %v161_v43, %v165_v44  ;;  %v2493_v42 = vld [vmem:[#allocation10 + $0x1e0] ss:$8 sps:$4 sm:$0xff]  }
  0x8b   :  { %v2498_v43 = vld [vmem:[#allocation10 + $0xd4] ss:$8 sps:$4 sm:$0xff]  }
  0x8c   :  { %v2501_v44 = vld [vmem:[#allocation10 + $0x1d4] ss:$8 sps:$4 sm:$0xff]  }
  0x8d   :  { %995 = vmatpush1.bf16.msra.mxu0 %v2185_v52  ;;  %1038 = vmatpush1.bf16.msra.mxu1 %v2187_v55  ;;  %v157_v52 = vld [vmem:[#allocation7 + $0x278] sm:$0xff]  ;;  %v2242_v55 = vcombine.high %v152_v49, %v156_v50  ;;  %v2502_v49 = vld [vmem:[#allocation10 + $0xc0] ss:$8 sps:$4 sm:$0xff]  }
  0x8e   :  { %996 = vmatprep.subr.bf16.mxu0 %v2178_v57  ;;  %1039 = vmatprep.subr.bf16.mxu1 %v2180_v60  ;;  %v2244_v57 = vcombine.high %v153_v51, %v157_v52  ;;  %v145_v60 = vld [vmem:[#allocation7 + $0x218] sm:$0xff]  ;;  %v2243_v63 = vcombine.low %v153_v51, %v157_v52  ;;  %v2505_v50 = vld [vmem:[#allocation10 + $0x1c0] ss:$8 sps:$4 sm:$0xff]  }
  0x8f   :  { %v2510_v51 = vld [vmem:[#allocation10 + $0xb4] ss:$8 sps:$4 sm:$0xff]  }
  0x90   :  { %v2513_v52 = vld [vmem:[#allocation10 + $0x1b4] ss:$8 sps:$4 sm:$0xff]  }
  0x91   :  { %997 = vmatpush1.bf16.msra.mxu0 %v2177_v61  ;;  %1040 = vmatpush1.bf16.msra.mxu1 %v2179_v0  ;;  %v149_v61 = vld [vmem:[#allocation7 + $0x238] sm:$0xff]  ;;  %v2234_v0 = vcombine.high %v144_v58, %v148_v59  ;;  %v2514_v58 = vld [vmem:[#allocation10 + $0xa0] ss:$8 sps:$4 sm:$0xff]  }
  0x92   :  { %998 = vmatprep.subr.bf16.mxu0 %v2170_v1  ;;  %1041 = vmatprep.subr.bf16.mxu1 %v2172_v4  ;;  %v2236_v1 = vcombine.high %v145_v60, %v149_v61  ;;  %v2235_v3 = vcombine.low %v145_v60, %v149_v61  ;;  %v2438_v4 = vld [vmem:[#allocation10 + $0x74] ss:$8 sps:$4 sm:$0xff]   ;;  %v2517_v59 = vld [vmem:[#allocation10 + $0x1a0] ss:$8 sps:$4 sm:$0xff]  }
  0x93   :  { %v2522_v60 = vld [vmem:[#allocation10 + $0x94] ss:$8 sps:$4 sm:$0xff]  }
  0x94   :  { %v2525_v61 = vld [vmem:[#allocation10 + $0x194] ss:$8 sps:$4 sm:$0xff]  }
  0x95   :  { %999 = vmatpush1.bf16.msra.mxu0 %v2169_v5  ;;  %1042 = vmatpush1.bf16.msra.mxu1 %v2171_v9  ;;  %v2441_v5 = vld [vmem:[#allocation10 + $0x174] ss:$8 sps:$4 sm:$0xff]   ;;  %v2444_v9 = vld [vmem:[#allocation10 + $0x64] ss:$8 sps:$4 sm:$0xff]  }
  0x96   :  { %1000 = vmatprep.subr.bf16.mxu0 %v2290_v10  ;;  %1043 = vmatprep.subr.bf16.mxu1 %v2292_v13  ;;  %v2447_v10 = vld [vmem:[#allocation10 + $0x164] ss:$8 sps:$4 sm:$0xff]   ;;  %v2450_v13 = vld [vmem:[#allocation10 + $0x54] ss:$8 sps:$4 sm:$0xff]  }
  0x99   :  { %1001 = vmatpush2.bf16.msra.mxu0 %v2289_v14  ;;  %1044 = vmatpush2.bf16.msra.mxu1 %v2291_v17  ;;  %v2453_v14 = vld [vmem:[#allocation10 + $0x154] ss:$8 sps:$4 sm:$0xff]   ;;  %v2456_v17 = vld [vmem:[#allocation10 + $0x44] ss:$8 sps:$4 sm:$0xff]  }
  0x9a   :  { %1002 = vmatprep.subr.bf16.mxu0 %v2282_v18  ;;  %1045 = vmatprep.subr.bf16.mxu1 %v2284_v21  ;;  %v2459_v18 = vld [vmem:[#allocation10 + $0x144] ss:$8 sps:$4 sm:$0xff]   ;;  %v2465_v21 = vld [vmem:[#allocation10 + $0x134] ss:$8 sps:$4 sm:$0xff]  }
  0x9d   :  { %1003 = vmatpush2.bf16.msra.mxu0 %v2281_v22  ;;  %1046 = vmatpush2.bf16.msra.mxu1 %v2283_v25  ;;  %v2460_v22 = vld [vmem:[#allocation10 + $0x30] ss:$8 sps:$4 sm:$0xff]   ;;  %v2471_v25 = vld [vmem:[#allocation10 + $0x124] ss:$8 sps:$4 sm:$0xff]  }
  0x9e   :  { %1004 = vmatprep.subr.bf16.mxu0 %v2274_v26  ;;  %1047 = vmatprep.subr.bf16.mxu1 %v2276_v29  ;;  %v2466_v26 = vld [vmem:[#allocation10 + $0x20] ss:$8 sps:$4 sm:$0xff]   ;;  %v2477_v29 = vld [vmem:[#allocation10 + $0x114] ss:$8 sps:$4 sm:$0xff]  }
  0xa1   :  { %1005 = vmatpush2.bf16.msra.mxu0 %v2273_v30  ;;  %1048 = vmatpush2.bf16.msra.mxu1 %v2275_v31  ;;  %v2472_v30 = vld [vmem:[#allocation10 + $0x10] ss:$8 sps:$4 sm:$0xff]  }
  0xa2   :  { %1006 = vmatprep.subr.bf16.mxu0 %v2266_v32  ;;  %1049 = vmatprep.subr.bf16.mxu1 %v2268_v33  ;;  %v2475_v31 = vld [vmem:[#allocation10 + $0x110] ss:$8 sps:$4 sm:$0xff]   ;;  %v2480_v32 = vld [vmem:[#allocation10 + $0x4] ss:$8 sps:$4 sm:$0xff]  }
  0xa3   :  { %v2483_v33 = vld [vmem:[#allocation10 + $0x104] ss:$8 sps:$4 sm:$0xff]  }
  0xa5   :  { %1007 = vmatpush2.bf16.msra.mxu0 %v2265_v38  ;;  %1050 = vmatpush2.bf16.msra.mxu1 %v2267_v39  ;;  %v2484_v38 = vld [vmem:[#allocation10 + $0xf0] ss:$8 sps:$4 sm:$0xff]  }
  0xa6   :  { %1008 = vmatprep.subr.bf16.mxu0 %v2258_v40  ;;  %1051 = vmatprep.subr.bf16.mxu1 %v2260_v56  ;;  %v2487_v39 = vld [vmem:[#allocation10 + $0x1f0] ss:$8 sps:$4 sm:$0xff]   ;;  %v2492_v40 = vld [vmem:[#allocation10 + $0xe4] ss:$8 sps:$4 sm:$0xff]  }
  0xa7   :  { %v2495_v56 = vld [vmem:[#allocation10 + $0x1e4] ss:$8 sps:$4 sm:$0xff]  }
  0xa9   :  { %1009 = vmatpush2.bf16.msra.mxu0 %v2257_v45  ;;  %1052 = vmatpush2.bf16.msra.mxu1 %v2259_v46  ;;  %v2496_v45 = vld [vmem:[#allocation10 + $0xd0] ss:$8 sps:$4 sm:$0xff]  }
  0xaa   :  { %1010 = vmatprep.subr.bf16.mxu0 %v2250_v47  ;;  %1053 = vmatprep.subr.bf16.mxu1 %v2252_v48  ;;  %v2499_v46 = vld [vmem:[#allocation10 + $0x1d0] ss:$8 sps:$4 sm:$0xff]   ;;  %v2504_v47 = vld [vmem:[#allocation10 + $0xc4] ss:$8 sps:$4 sm:$0xff]  }
  0xab   :  { %v2507_v48 = vld [vmem:[#allocation10 + $0x1c4] ss:$8 sps:$4 sm:$0xff]  }
  0xad   :  { %1011 = vmatpush2.bf16.msra.mxu0 %v2249_v53  ;;  %1054 = vmatpush2.bf16.msra.mxu1 %v2251_v54  ;;  %v2508_v53 = vld [vmem:[#allocation10 + $0xb0] ss:$8 sps:$4 sm:$0xff]  }
  0xae   :  { %1012 = vmatprep.subr.bf16.mxu0 %v2242_v55  ;;  %1055 = vmatprep.subr.bf16.mxu1 %v2244_v57  ;;  %v2511_v54 = vld [vmem:[#allocation10 + $0x1b0] ss:$8 sps:$4 sm:$0xff]   ;;  %v2516_v55 = vld [vmem:[#allocation10 + $0xa4] ss:$8 sps:$4 sm:$0xff]  }
  0xaf   :  { %v2519_v57 = vld [vmem:[#allocation10 + $0x1a4] ss:$8 sps:$4 sm:$0xff]  }
  0xb1   :  { %1013 = vmatpush2.bf16.msra.mxu0 %v2241_v62  ;;  %1056 = vmatpush2.bf16.msra.mxu1 %v2243_v63  ;;  %v2520_v62 = vld [vmem:[#allocation10 + $0x90] ss:$8 sps:$4 sm:$0xff]  }
  0xb2   :  { %1014 = vmatprep.subr.bf16.mxu0 %v2234_v0  ;;  %1057 = vmatprep.subr.bf16.mxu1 %v2236_v1  ;;  %v2523_v63 = vld [vmem:[#allocation10 + $0x190] ss:$8 sps:$4 sm:$0xff]   ;;  %v2528_v0 = vld [vmem:[#allocation10 + $0x84] ss:$8 sps:$4 sm:$0xff]  }
  0xb3   :  { %v2531_v1 = vld [vmem:[#allocation10 + $0x184] ss:$8 sps:$4 sm:$0xff]  }
  0xb5   :  { %1015 = vmatpush2.bf16.msra.mxu0 %v2233_v2  ;;  %1058 = vmatpush2.bf16.msra.mxu1 %v2235_v3  ;;  %v2526_v2 = vld [vmem:[#allocation10 + $0x80] ss:$8 sps:$4 sm:$0xff]  }
  0xb6   :  { %1874 = vmatprep.subr.bf16.mxu0 %v2438_v4  ;;  %1917 = vmatprep.subr.bf16.mxu1 %v2441_v5  ;;  %v2529_v3 = vld [vmem:[#allocation10 + $0x180] ss:$8 sps:$4 sm:$0xff]   ;;  %v2534_v4 = vld [vmem:[#allocation10 + $0x274] ss:$8 sps:$4 sm:$0xff]  }
  0xb7   :  { %v2537_v5 = vld [vmem:[#allocation10 + $0x374] ss:$8 sps:$4 sm:$0xff]  }
  0xb8   :  { %1017 = vmatmul.mubr.bf16.vlgmr.msra.gmra.mxu0 %v2799_v6  ;;  %1060 = vmatmul.mubr.bf16.vlgmr.msra.gmra.mxu1 %v2799_v6  ;;  %v2457_v6 = vld [vmem:[#allocation10 + $0x140] ss:$8 sps:$4 sm:$0xff]  }
  0xb9   :  { %1875 = vmatpush1.bf16.msra.mxu0 %v2436_v7  ;;  %1918 = vmatpush1.bf16.msra.mxu1 %v2439_v8  ;;  %v208_v7 = vlaneseq }
  0xba   :  { %1876 = vmatprep.subr.bf16.mxu0 %v2444_v9  ;;  %1919 = vmatprep.subr.bf16.mxu1 %v2447_v10 }
  0xbb   :  { %v2808_v8 = vshrl.u32 %v208_v7, 7 }
  0xbd   :  { %1877 = vmatpush1.bf16.msra.mxu0 %v2442_v11  ;;  %1920 = vmatpush1.bf16.msra.mxu1 %v2445_v12  ;;  %v218_v9 = vsub.s32 2, %v2808_v8  ;;  %v214_v10 = vsub.s32 1, %v2808_v8  ;;  %v2812_v11 = vld [vmem:[#allocation9] sm:$0xff]  ;;  %v210_v12 = vsub.s32 0, %v2808_v8 }
  0xbe   :  { %1878 = vmatprep.subr.bf16.mxu0 %v2450_v13  ;;  %1921 = vmatprep.subr.bf16.mxu1 %v2453_v14  ;;  %v222_v13 = vsub.s32 3, %v2808_v8 }
  0xc1   :  { %1879 = vmatpush1.bf16.msra.mxu0 %v2448_v15  ;;  %1922 = vmatpush1.bf16.msra.mxu1 %v2451_v16  ;;  %v219_v15 = vrot.slane %v2812_v11, %v218_v9  ;;  %v2571_v9 = vld [vmem:[#allocation10 + $0x310] ss:$8 sps:$4 sm:$0xff]  }
  0xc2   :  { %1880 = vmatprep.subr.bf16.mxu0 %v2456_v17  ;;  %1923 = vmatprep.subr.bf16.mxu1 %v2459_v18  ;;  %v215_v17 = vrot.slane %v2812_v11, %v214_v10  ;;  %v211_v18 = vrot.slane %v2812_v11, %v210_v12 }
  0xc5   :  { %1881 = vmatpush1.bf16.msra.mxu0 %v2454_v19  ;;  %1924 = vmatpush1.bf16.msra.mxu1 %v2457_v6  ;;  %v223_v6 = vrot.slane %v2812_v11, %v222_v13  ;;  %v2576_v13 = vld [vmem:[#allocation10 + $0x204] ss:$8 sps:$4 sm:$0xff]  }
  0xc6   :  { %1882 = vmatprep.subr.bf16.mxu0 %v2462_v20  ;;  %1925 = vmatprep.subr.bf16.mxu1 %v2465_v21 }
  0xc9   :  { %1883 = vmatpush1.bf16.msra.mxu0 %v2460_v22  ;;  %1926 = vmatpush1.bf16.msra.mxu1 %v2463_v23 }
  0xca   :  { %1884 = vmatprep.subr.bf16.mxu0 %v2468_v24  ;;  %1927 = vmatprep.subr.bf16.mxu1 %v2471_v25 }
  0xcd   :  { %1885 = vmatpush1.bf16.msra.mxu0 %v2466_v26  ;;  %1928 = vmatpush1.bf16.msra.mxu1 %v2469_v27 }
  0xce   :  { %1886 = vmatprep.subr.bf16.mxu0 %v2474_v28  ;;  %1929 = vmatprep.subr.bf16.mxu1 %v2477_v29 }
  0xd1   :  { %1887 = vmatpush1.bf16.msra.mxu0 %v2472_v30  ;;  %1930 = vmatpush1.bf16.msra.mxu1 %v2475_v31 }
  0xd2   :  { %1888 = vmatprep.subr.bf16.mxu0 %v2480_v32  ;;  %1931 = vmatprep.subr.bf16.mxu1 %v2483_v33 }
  0xd5   :  { %1889 = vmatpush1.bf16.msra.mxu0 %v2478_v34  ;;  %1932 = vmatpush1.bf16.msra.mxu1 %v2481_v35 }
  0xd6   :  { %1890 = vmatprep.subr.bf16.mxu0 %v2486_v36  ;;  %1933 = vmatprep.subr.bf16.mxu1 %v2489_v37 }
  0xd9   :  { %1891 = vmatpush2.bf16.msra.mxu0 %v2484_v38  ;;  %1934 = vmatpush2.bf16.msra.mxu1 %v2487_v39 }
  0xda   :  { %1892 = vmatprep.subr.bf16.mxu0 %v2492_v40  ;;  %1935 = vmatprep.subr.bf16.mxu1 %v2495_v56 }
  0xdd   :  { %1893 = vmatpush2.bf16.msra.mxu0 %v2490_v41  ;;  %1936 = vmatpush2.bf16.msra.mxu1 %v2493_v42  ;;  %v2532_v41 = vld [vmem:[#allocation10 + $0x270] ss:$8 sps:$4 sm:$0xff]  }
  0xde   :  { %1894 = vmatprep.subr.bf16.mxu0 %v2498_v43  ;;  %1937 = vmatprep.subr.bf16.mxu1 %v2501_v44  ;;  %v2535_v44 = vld [vmem:[#allocation10 + $0x370] ss:$8 sps:$4 sm:$0xff]  }
  0xe1   :  { %1895 = vmatpush2.bf16.msra.mxu0 %v2496_v45  ;;  %1938 = vmatpush2.bf16.msra.mxu1 %v2499_v46  ;;  %v2540_v45 = vld [vmem:[#allocation10 + $0x264] ss:$8 sps:$4 sm:$0xff]  }
  0xe2   :  { %1896 = vmatprep.subr.bf16.mxu0 %v2504_v47  ;;  %1939 = vmatprep.subr.bf16.mxu1 %v2507_v48  ;;  %v2543_v47 = vld [vmem:[#allocation10 + $0x364] ss:$8 sps:$4 sm:$0xff]   ;;  %v2538_v48 = vld [vmem:[#allocation10 + $0x260] ss:$8 sps:$4 sm:$0xff]  }
  0xe5   :  { %1897 = vmatpush2.bf16.msra.mxu0 %v2502_v49  ;;  %1940 = vmatpush2.bf16.msra.mxu1 %v2505_v50  ;;  %v2541_v49 = vld [vmem:[#allocation10 + $0x360] ss:$8 sps:$4 sm:$0xff]   ;;  %v2546_v50 = vld [vmem:[#allocation10 + $0x254] ss:$8 sps:$4 sm:$0xff]  }
  0xe6   :  { %1898 = vmatprep.subr.bf16.mxu0 %v2510_v51  ;;  %1941 = vmatprep.subr.bf16.mxu1 %v2513_v52  ;;  %v2549_v51 = vld [vmem:[#allocation10 + $0x354] ss:$8 sps:$4 sm:$0xff]   ;;  %v2544_v52 = vld [vmem:[#allocation10 + $0x250] ss:$8 sps:$4 sm:$0xff]  }
  0xe9   :  { %1899 = vmatpush2.bf16.msra.mxu0 %v2508_v53  ;;  %1942 = vmatpush2.bf16.msra.mxu1 %v2511_v54  ;;  %v2547_v53 = vld [vmem:[#allocation10 + $0x350] ss:$8 sps:$4 sm:$0xff]   ;;  %v2552_v54 = vld [vmem:[#allocation10 + $0x244] ss:$8 sps:$4 sm:$0xff]  }
  0xea   :  { %1900 = vmatprep.subr.bf16.mxu0 %v2516_v55  ;;  %1943 = vmatprep.subr.bf16.mxu1 %v2519_v57  ;;  %v2555_v55 = vld [vmem:[#allocation10 + $0x344] ss:$8 sps:$4 sm:$0xff]   ;;  %v2550_v57 = vld [vmem:[#allocation10 + $0x240] ss:$8 sps:$4 sm:$0xff]  }
  0xed   :  { %1901 = vmatpush2.bf16.msra.mxu0 %v2514_v58  ;;  %1944 = vmatpush2.bf16.msra.mxu1 %v2517_v59  ;;  %v2553_v58 = vld [vmem:[#allocation10 + $0x340] ss:$8 sps:$4 sm:$0xff]   ;;  %v2558_v59 = vld [vmem:[#allocation10 + $0x234] ss:$8 sps:$4 sm:$0xff]  }
  0xee   :  { %1902 = vmatprep.subr.bf16.mxu0 %v2522_v60  ;;  %1945 = vmatprep.subr.bf16.mxu1 %v2525_v61  ;;  %v2561_v60 = vld [vmem:[#allocation10 + $0x334] ss:$8 sps:$4 sm:$0xff]   ;;  %v2556_v61 = vld [vmem:[#allocation10 + $0x230] ss:$8 sps:$4 sm:$0xff]  }
  0xf1   :  { %1903 = vmatpush2.bf16.msra.mxu0 %v2520_v62  ;;  %1946 = vmatpush2.bf16.msra.mxu1 %v2523_v63  ;;  %v2559_v62 = vld [vmem:[#allocation10 + $0x330] ss:$8 sps:$4 sm:$0xff]   ;;  %v2564_v63 = vld [vmem:[#allocation10 + $0x224] ss:$8 sps:$4 sm:$0xff]  }
  0xf2   :  { %1904 = vmatprep.subr.bf16.mxu0 %v2528_v0  ;;  %1947 = vmatprep.subr.bf16.mxu1 %v2531_v1  ;;  %v2567_v0 = vld [vmem:[#allocation10 + $0x324] ss:$8 sps:$4 sm:$0xff]   ;;  %v2562_v1 = vld [vmem:[#allocation10 + $0x220] ss:$8 sps:$4 sm:$0xff]  }
  0xf5   :  { %1905 = vmatpush2.bf16.msra.mxu0 %v2526_v2  ;;  %1948 = vmatpush2.bf16.msra.mxu1 %v2529_v3  ;;  %v2565_v2 = vld [vmem:[#allocation10 + $0x320] ss:$8 sps:$4 sm:$0xff]   ;;  %v2570_v3 = vld [vmem:[#allocation10 + $0x214] ss:$8 sps:$4 sm:$0xff]  }
  0xf6   :  { %1960 = vmatprep.subr.bf16.mxu0 %v2534_v4  ;;  %2003 = vmatprep.subr.bf16.mxu1 %v2537_v5  ;;  %v2573_v4 = vld [vmem:[#allocation10 + $0x314] ss:$8 sps:$4 sm:$0xff]   ;;  %v2568_v5 = vld [vmem:[#allocation10 + $0x210] ss:$8 sps:$4 sm:$0xff]  }
 0x138   :  { %v932_v14 = vpop.f32.mrf.mxu0  ;;  %v975_v16 = vpop.f32.mrf.mxu1 }
 0x139   :  { %v976_v22 = vadd.f32 %v975_v16, %v219_v15  ;;  %v933_v26 = vadd.f32 %v932_v14, %v211_v18  ;;  %v2579_v14 = vld [vmem:[#allocation10 + $0x304] ss:$8 sps:$4 sm:$0xff]   ;;  %v2577_v16 = vld [vmem:[#allocation10 + $0x300] ss:$8 sps:$4 sm:$0xff]  }
 0x13a   :  { %v934_v19 = vpop.f32.mrf.mxu0  ;;  %v977_v20 = vpop.f32.mrf.mxu1 }
 0x13b   :  { %v935_v23 = vadd.f32 %v934_v19, %v215_v17  ;;  %v978_v27 = vadd.f32 %v977_v20, %v223_v6  ;;  %v1072_v34 = vmax.f32 %v976_v22, 0.0  ;;  %v1070_v38 = vmax.f32 %v933_v26, 0.0  ;;  %v2580_v19 = vld [vmem:[#allocation10 + $0x2f0] ss:$8 sps:$4 sm:$0xff]   ;;  %v2588_v20 = vld [vmem:[#allocation10 + $0x2e4] ss:$8 sps:$4 sm:$0xff]  }
 0x13c   :  { %v936_v21 = vpop.f32.mrf.mxu0  ;;  %v979_v25 = vpop.f32.mrf.mxu1  ;;  %v2586_v22 = vld [vmem:[#allocation10 + $0x2e0] ss:$8 sps:$4 sm:$0xff]   ;;  %v2592_v26 = vld [vmem:[#allocation10 + $0x2d0] ss:$8 sps:$4 sm:$0xff]  }
 0x13d   :  { %v937_v24 = vadd.f32 %v936_v21, %v211_v18  ;;  %v980_v28 = vadd.f32 %v979_v25, %v219_v15  ;;  %v1071_v35 = vmax.f32 %v935_v23, 0.0  ;;  %v1073_v39 = vmax.f32 %v978_v27, 0.0  ;;  %v2574_v15 = vld [vmem:[#allocation10 + $0x200] ss:$8 sps:$4 sm:$0xff]   ;;  %v2585_v18 = vld [vmem:[#allocation10 + $0x3f4] ss:$8 sps:$4 sm:$0xff]  }
 0x13e   :  { %v938_v29 = vpop.f32.mrf.mxu0  ;;  %v981_v31 = vpop.f32.mrf.mxu1  ;;  %v2591_v21 = vld [vmem:[#allocation10 + $0x3e4] ss:$8 sps:$4 sm:$0xff]   ;;  %v2589_v23 = vld [vmem:[#allocation10 + $0x3e0] ss:$8 sps:$4 sm:$0xff]   ;;  %v2597_v25 = vld [vmem:[#allocation10 + $0x3d4] ss:$8 sps:$4 sm:$0xff]  }
 0x13f   :  { %v939_v30 = vadd.f32 %v938_v29, %v215_v17  ;;  %v1078_v32 = vmax.f32 %v937_v24, 0.0  ;;  %v982_v33 = vadd.f32 %v981_v31, %v223_v6  ;;  %v1080_v36 = vmax.f32 %v980_v28, 0.0  ;;  %v2582_v17 = vld [vmem:[#allocation10 + $0x2f4] ss:$8 sps:$4 sm:$0xff]   ;;  %v2583_v6 = vld [vmem:[#allocation10 + $0x3f0] ss:$8 sps:$4 sm:$0xff]  }
 0x140   :  { %v2594_v24 = vld [vmem:[#allocation10 + $0x2d4] ss:$8 sps:$4 sm:$0xff]   ;;  %v2595_v27 = vld [vmem:[#allocation10 + $0x3d0] ss:$8 sps:$4 sm:$0xff]   ;;  %v2600_v28 = vld [vmem:[#allocation10 + $0x2c4] ss:$8 sps:$4 sm:$0xff]  }
 0x141   :  { %v1079_v37 = vmax.f32 %v939_v30, 0.0  ;;  %v1081_v40 = vmax.f32 %v982_v33, 0.0  ;;  %v1086_v42 = vpack.c.bf16 %v1078_v32, %v1070_v38  ;;  %v1088_v46 = vpack.c.bf16 %v1080_v36, %v1072_v34  ;;  %v2603_v29 = vld [vmem:[#allocation10 + $0x3c4] ss:$8 sps:$4 sm:$0xff]   ;;  %v2598_v30 = vld [vmem:[#allocation10 + $0x2c0] ss:$8 sps:$4 sm:$0xff]  }
 0x142   :  { %v2601_v31 = vld [vmem:[#allocation10 + $0x3c0] ss:$8 sps:$4 sm:$0xff]   ;;  %v2606_v32 = vld [vmem:[#allocation10 + $0x2b4] ss:$8 sps:$4 sm:$0xff]   ;;  %v2604_v34 = vld [vmem:[#allocation10 + $0x2b0] ss:$8 sps:$4 sm:$0xff]  }
 0x143   :  { %v1087_v56 = vpack.c.bf16 %v1079_v37, %v1071_v35  ;;  %v1089_v43 = vpack.c.bf16 %v1081_v40, %v1073_v39  ;;  %v2609_v33 = vld [vmem:[#allocation10 + $0x3b4] ss:$8 sps:$4 sm:$0xff]   ;;  %v2607_v35 = vld [vmem:[#allocation10 + $0x3b0] ss:$8 sps:$4 sm:$0xff]   ;;  %v2612_v36 = vld [vmem:[#allocation10 + $0x2a4] ss:$8 sps:$4 sm:$0xff]  }
 0x144   :  { %v230_v37 = vsub.s32 5, %v2808_v8  ;;  %v2615_v38 = vld [vmem:[#allocation10 + $0x3a4] ss:$8 sps:$4 sm:$0xff]   ;;  %v226_v39 = vsub.s32 4, %v2808_v8  ;;  %v238_v40 = vsub.s32 7, %v2808_v8 }
 0x145   :  { %1906 = vmatprep.mubr.bf16.mxu0 %v1087_v56  ;;  %1949 = vmatprep.mubr.bf16.mxu1 %v1089_v43  ;;  %v234_v56 = vsub.s32 6, %v2808_v8  ;;  %v2613_v43 = vld [vmem:[#allocation10 + $0x3a0] ss:$8 sps:$4 sm:$0xff]  }
 0x146   :  { %1907 = vmatmul.mubr.bf16.vlgmr.msra.gmra.mxu0 %v1086_v42  ;;  %1950 = vmatmul.mubr.bf16.vlgmr.msra.gmra.mxu1 %v1088_v46  ;;  %v231_v46 = vrot.slane %v2812_v11, %v230_v37 }
 0x147   :  { %1961 = vmatpush1.bf16.msra.mxu0 %v2532_v41  ;;  %2004 = vmatpush1.bf16.msra.mxu1 %v2535_v44  ;;  %v2610_v41 = vld [vmem:[#allocation10 + $0x2a0] ss:$8 sps:$4 sm:$0xff]   ;;  %v2618_v44 = vld [vmem:[#allocation10 + $0x294] ss:$8 sps:$4 sm:$0xff]  }
 0x148   :  { %1962 = vmatprep.subr.bf16.mxu0 %v2540_v45  ;;  %2005 = vmatprep.subr.bf16.mxu1 %v2543_v47  ;;  %v2621_v47 = vld [vmem:[#allocation10 + $0x394] ss:$8 sps:$4 sm:$0xff]  }
 0x14b   :  { %1963 = vmatpush1.bf16.msra.mxu0 %v2538_v48  ;;  %2006 = vmatpush1.bf16.msra.mxu1 %v2541_v49  ;;  %v227_v48 = vrot.slane %v2812_v11, %v226_v39 }
 0x14c   :  { %1964 = vmatprep.subr.bf16.mxu0 %v2546_v50  ;;  %2007 = vmatprep.subr.bf16.mxu1 %v2549_v51  ;;  %v239_v50 = vrot.slane %v2812_v11, %v238_v40  ;;  %v235_v51 = vrot.slane %v2812_v11, %v234_v56 }
 0x14f   :  { %1965 = vmatpush1.bf16.msra.mxu0 %v2544_v52  ;;  %2008 = vmatpush1.bf16.msra.mxu1 %v2547_v53  ;;  %v2616_v53 = vld [vmem:[#allocation10 + $0x290] ss:$8 sps:$4 sm:$0xff]  }
 0x150   :  { %1966 = vmatprep.subr.bf16.mxu0 %v2552_v54  ;;  %2009 = vmatprep.subr.bf16.mxu1 %v2555_v55  ;;  %v2619_v55 = vld [vmem:[#allocation10 + $0x390] ss:$8 sps:$4 sm:$0xff]  }
 0x153   :  { %1967 = vmatpush1.bf16.msra.mxu0 %v2550_v57  ;;  %2010 = vmatpush1.bf16.msra.mxu1 %v2553_v58  ;;  %v2624_v57 = vld [vmem:[#allocation10 + $0x284] ss:$8 sps:$4 sm:$0xff]  }
 0x154   :  { %1968 = vmatprep.subr.bf16.mxu0 %v2558_v59  ;;  %2011 = vmatprep.subr.bf16.mxu1 %v2561_v60 }
 0x157   :  { %1969 = vmatpush1.bf16.msra.mxu0 %v2556_v61  ;;  %2012 = vmatpush1.bf16.msra.mxu1 %v2559_v62  ;;  %v2627_v61 = vld [vmem:[#allocation10 + $0x384] ss:$8 sps:$4 sm:$0xff]  }
 0x158   :  { %1970 = vmatprep.subr.bf16.mxu0 %v2564_v63  ;;  %2013 = vmatprep.subr.bf16.mxu1 %v2567_v0 }
 0x15b   :  { %1971 = vmatpush1.bf16.msra.mxu0 %v2562_v1  ;;  %2014 = vmatpush1.bf16.msra.mxu1 %v2565_v2 }
 0x15c   :  { %1972 = vmatprep.subr.bf16.mxu0 %v2570_v3  ;;  %2015 = vmatprep.subr.bf16.mxu1 %v2573_v4  ;;  %v2622_v4 = vld [vmem:[#allocation10 + $0x280] ss:$8 sps:$4 sm:$0xff]  }
 0x15f   :  { %1973 = vmatpush1.bf16.msra.mxu0 %v2568_v5  ;;  %2016 = vmatpush1.bf16.msra.mxu1 %v2571_v9 }
 0x160   :  { %1974 = vmatprep.subr.bf16.mxu0 %v2576_v13  ;;  %2017 = vmatprep.subr.bf16.mxu1 %v2579_v14  ;;  %v2625_v13 = vld [vmem:[#allocation10 + $0x380] ss:$8 sps:$4 sm:$0xff]  }
 0x163   :  { %1975 = vmatpush1.bf16.msra.mxu0 %v2574_v15  ;;  %2018 = vmatpush1.bf16.msra.mxu1 %v2577_v16 }
 0x164   :  { %1976 = vmatprep.subr.bf16.mxu0 %v2582_v17  ;;  %2019 = vmatprep.subr.bf16.mxu1 %v2585_v18 }
 0x167   :  { %1977 = vmatpush2.bf16.msra.mxu0 %v2580_v19  ;;  %2020 = vmatpush2.bf16.msra.mxu1 %v2583_v6 }
 0x168   :  { %1978 = vmatprep.subr.bf16.mxu0 %v2588_v20  ;;  %2021 = vmatprep.subr.bf16.mxu1 %v2591_v21 }
 0x16b   :  { %1979 = vmatpush2.bf16.msra.mxu0 %v2586_v22  ;;  %2022 = vmatpush2.bf16.msra.mxu1 %v2589_v23 }
 0x16c   :  { %1980 = vmatprep.subr.bf16.mxu0 %v2594_v24  ;;  %2023 = vmatprep.subr.bf16.mxu1 %v2597_v25  ;;  %v2054_v24 = vand.u32 127, %v208_v7  ;;  %v2056_v25 = vmul.u32 256, %v2808_v8 }
 0x16f   :  { %1981 = vmatpush2.bf16.msra.mxu0 %v2592_v26  ;;  %2024 = vmatpush2.bf16.msra.mxu1 %v2595_v27  ;;  %v2049_v26 = vadd.s32 8, %v2808_v8  ;;  %v2055_v27 = vadd.s32 128, %v2054_v24 }
 0x170   :  { %1982 = vmatprep.subr.bf16.mxu0 %v2600_v28  ;;  %2025 = vmatprep.subr.bf16.mxu1 %v2603_v29  ;;  %v2058_v28 = vadd.s32 %v2056_v25, %v2054_v24 }
 0x171   :  { %v2057_v29 = vmul.u32 256, %v2049_v26 }
 0x173   :  { %1983 = vmatpush2.bf16.msra.mxu0 %v2598_v30  ;;  %2026 = vmatpush2.bf16.msra.mxu1 %v2601_v31  ;;  %v2059_v30 = vadd.s32 %v2056_v25, %v2055_v27  ;;  %v2062_v31 = vmul.u32 2654435769, %v2058_v28 }
 0x174   :  { %1984 = vmatprep.subr.bf16.mxu0 %v2606_v32  ;;  %2027 = vmatprep.subr.bf16.mxu1 %v2609_v33  ;;  %v2060_v32 = vadd.s32 %v2057_v29, %v2054_v24  ;;  %v2067_v33 = vstv %s2848_s0 }
 0x176   :  { %v2064_v37 = vmul.u32 2654435769, %v2060_v32 }
 0x177   :  { %1985 = vmatpush2.bf16.msra.mxu0 %v2604_v34  ;;  %2028 = vmatpush2.bf16.msra.mxu1 %v2607_v35  ;;  %v2061_v34 = vadd.s32 %v2057_v29, %v2055_v27  ;;  %v2063_v35 = vmul.u32 2654435769, %v2059_v30  ;;  %v1222_v27 = vld [vmem:[%s2853_s5] sm:$0x3]  ;;  %s2745_s5 = smov [#allocation12]  }
 0x178   :  { %v1018_v42 = vpop.f32.mrf.mxu0  ;;  %1986 = vmatprep.subr.bf16.mxu0 %v2612_v36  ;;  %v1061_v45 = vpop.f32.mrf.mxu1  ;;  %2029 = vmatprep.subr.bf16.mxu1 %v2615_v38  ;;  %v2068_v36 = vadd.s32 %v2067_v33, %v2062_v31  ;;  %v2070_v40 = vadd.s32 %v2067_v33, %v2064_v37  ;;  %v1227_v31 = vrot.slane %v1222_v27, %v210_v12  ;;  %s2149_s20 = sshll.u32 %s2745_s5, 4  ;;  %s2150_s20 = int_to_ptr.vmem [resolvable:$true] %s2149_s20 }
 0x179   :  { %v1019_v62 = vadd.f32 %v1018_v42, %v227_v48  ;;  %v1062_v2 = vadd.f32 %v1061_v45, %v235_v51  ;;  %v2065_v38 = vmul.u32 2654435769, %v2061_v34  ;;  %v2069_v7 = vadd.s32 %v2067_v33, %v2063_v35  ;;  %s2708_s21 = scalar_lea.vmem %s2150_s20, 512  ;;  %p2713_p7 = scmp.lt.s32.totalorder %s2150_s20, %s2150_s20 }
 0x17a   :  { %v1020_v49 = vpop.f32.mrf.mxu0  ;;  %v1063_v52 = vpop.f32.mrf.mxu1  ;;  %v2072_v39 = vand.u32 2147483647, %v2068_v36  ;;  %p2709_p6 = scmp.ne.s32.totalorder %s2150_s20, %s2708_s21  ;;  %p2714_p8 = scmp.lt.s32.totalorder %s2708_s21, %s2708_s21 }
 0x17b   :  { %1987 = vmatpush2.bf16.msra.mxu0 %v2610_v41  ;;  %2030 = vmatpush2.bf16.msra.mxu1 %v2613_v43  ;;  %v1021_v58 = vadd.f32 %v1020_v49, %v231_v46  ;;  %v1064_v63 = vadd.f32 %v1063_v52, %v239_v50  ;;  %v1074_v17 = vmax.f32 %v1019_v62, 0.0  ;;  %v1076_v6 = vmax.f32 %v1062_v2, 0.0 }
 0x17c   :  { %v1022_v54 = vpop.f32.mrf.mxu0  ;;  %1988 = vmatprep.subr.bf16.mxu0 %v2618_v44  ;;  %v1065_v60 = vpop.f32.mrf.mxu1  ;;  %2031 = vmatprep.subr.bf16.mxu1 %v2621_v47  ;;  %v2071_v56 = vadd.s32 %v2067_v33, %v2065_v38  ;;  %v2073_v41 = vand.u32 2147483647, %v2069_v7  ;;  %v2076_v42 = vshra.s32 %v2072_v39, 16  ;;  %v2074_v43 = vand.u32 2147483647, %v2070_v40  ;;  %p2715_p9 = por %p2714_p8, %p2713_p7 }
 0x17d   :  { %v1023_v59 = vadd.f32 %v1022_v54, %v227_v48  ;;  %v1066_v0 = vadd.f32 %v1065_v60, %v235_v51  ;;  %v1075_v14 = vmax.f32 %v1021_v58, 0.0  ;;  %v1077_v18 = vmax.f32 %v1064_v63, 0.0 }
 0x17e   :  { %v1024_v1 = vpop.f32.mrf.mxu0  ;;  %v1067_v11 = vpop.f32.mrf.mxu1  ;;  %v2075_v44 = vand.u32 2147483647, %v2071_v56  ;;  %v2077_v45 = vshra.s32 %v2073_v41, 16  ;;  %v2078_v47 = vshra.s32 %v2074_v43, 16  ;;  %p2716_p10 = pnand %p2715_p9, %p2709_p6 }
 0x17f   :  { %v1025_v3 = vadd.f32 %v1024_v1, %v231_v46  ;;  %1989 = vmatpush2.bf16.msra.mxu0 %v2616_v53  ;;  %v1082_v5 = vmax.f32 %v1023_v59, 0.0  ;;  %v1068_v9 = vadd.f32 %v1067_v11, %v239_v50  ;;  %2032 = vmatpush2.bf16.msra.mxu1 %v2619_v55  ;;  %v1084_v15 = vmax.f32 %v1066_v0, 0.0 }
 0x180   :  { %1990 = vmatprep.subr.bf16.mxu0 %v2624_v57  ;;  %2033 = vmatprep.subr.bf16.mxu1 %v2627_v61  ;;  %v2080_v46 = vxor.u32 %v2076_v42, %v2068_v36  ;;  %v2079_v48 = vshra.s32 %v2075_v44, 16  ;;  %v2081_v49 = vxor.u32 %v2077_v45, %v2069_v7  ;;  %v2082_v51 = vxor.u32 %v2078_v47, %v2070_v40 }
 0x181   :  { %v1083_v16 = vmax.f32 %v1025_v3, 0.0  ;;  %v1085_v19 = vmax.f32 %v1068_v9, 0.0  ;;  %v1090_v21 = vpack.c.bf16 %v1082_v5, %v1074_v17  ;;  %v1092_v23 = vpack.c.bf16 %v1084_v15, %v1076_v6 }
 0x182   :  { %v2084_v50 = vmul.u32 2246822507, %v2080_v46  ;;  %v2083_v52 = vxor.u32 %v2079_v48, %v2071_v56  ;;  %v2085_v53 = vmul.u32 2246822507, %v2081_v49  ;;  %v1231_v36 = vrot.slane %v1222_v27, %v214_v10 }
 0x183   :  { %v1091_v20 = vpack.c.bf16 %v1083_v16, %v1075_v14  ;;  %1991 = vmatpush2.bf16.msra.mxu0 %v2622_v4  ;;  %v1093_v22 = vpack.c.bf16 %v1085_v19, %v1077_v18  ;;  %2034 = vmatpush2.bf16.msra.mxu1 %v2625_v13  ;;  %v2086_v55 = vmul.u32 2246822507, %v2082_v51 }
 0x184   :  { %v2088_v54 = vand.u32 2147483647, %v2084_v50  ;;  %v2087_v57 = vmul.u32 2246822507, %v2083_v52  ;;  %v2089_v58 = vand.u32 2147483647, %v2085_v53 }
 0x185   :  { %1992 = vmatprep.mubr.bf16.mxu0 %v1091_v20  ;;  %2035 = vmatprep.mubr.bf16.mxu1 %v1093_v22  ;;  %v2090_v60 = vand.u32 2147483647, %v2086_v55  ;;  %v2744_v52 = vmov 0.0  }
 0x186   :  { %1993 = vmatmul.mubr.bf16.vlgmr.msra.gmra.mxu0 %v1090_v21  ;;  %2036 = vmatmul.mubr.bf16.vlgmr.msra.gmra.mxu1 %v1092_v23  ;;  %v2092_v59 = vshra.s32 %v2088_v54, 13  ;;  %v2091_v61 = vand.u32 2147483647, %v2087_v57  ;;  %v2093_v62 = vshra.s32 %v2089_v58, 13 }
 0x187   :  { %v2094_v0 = vshra.s32 %v2090_v60, 13 }
 0x188   :  { %v2096_v63 = vxor.u32 %v2092_v59, %v2084_v50  ;;  %v2095_v1 = vshra.s32 %v2091_v61, 13  ;;  %v2097_v2 = vxor.u32 %v2093_v62, %v2085_v53 }
 0x189   :  { %v2098_v11 = vxor.u32 %v2094_v0, %v2086_v55 }
 0x18a   :  { %v2100_v3 = vmul.u32 3266489909, %v2096_v63  ;;  %v2099_v4 = vxor.u32 %v2095_v1, %v2087_v57  ;;  %v2101_v5 = vmul.u32 3266489909, %v2097_v2 }
 0x18b   :  { %v2102_v13 = vmul.u32 3266489909, %v2098_v11 }
 0x18c   :  { %v2104_v9 = vand.u32 2147483647, %v2100_v3  ;;  %v2103_v14 = vmul.u32 3266489909, %v2099_v4  ;;  %v2105_v15 = vand.u32 2147483647, %v2101_v5 }
 0x18d   :  { %v2106_v17 = vand.u32 2147483647, %v2102_v13 }
 0x18e   :  { %v2108_v16 = vshra.s32 %v2104_v9, 16  ;;  %v2107_v18 = vand.u32 2147483647, %v2103_v14  ;;  %v2109_v19 = vshra.s32 %v2105_v15, 16 }
 0x18f   :  { %v2110_v20 = vshra.s32 %v2106_v17, 16 }
 0x190   :  { %v2112_v6 = vxor.u32 %v2108_v16, %v2100_v3  ;;  %v2111_v21 = vshra.s32 %v2107_v18, 16  ;;  %v2113_v22 = vxor.u32 %v2109_v19, %v2101_v5 }
 0x191   :  { %v2114_v26 = vxor.u32 %v2110_v20, %v2102_v13 }
 0x192   :  { %v2116_v25 = vand.u32 8388607, %v2112_v6  ;;  %v2115_v28 = vxor.u32 %v2111_v21, %v2103_v14  ;;  %v2117_v29 = vand.u32 8388607, %v2113_v22 }
 0x193   :  { %v2118_v34 = vand.u32 8388607, %v2114_v26 }
 0x194   :  { %v2120_v33 = vcvt.s32.f32 %v2116_v25  ;;  %v2119_v35 = vand.u32 8388607, %v2115_v28  ;;  %v2121_v37 = vcvt.s32.f32 %v2117_v29 }
 0x195   :  { %v2122_v56 = vcvt.s32.f32 %v2118_v34 }
 0x196   :  { %v2124_v40 = vmul.f32 1.1920929e-07, %v2120_v33  ;;  %v2123_v41 = vcvt.s32.f32 %v2119_v35  ;;  %v2125_v43 = vmul.f32 1.1920929e-07, %v2121_v37 }
 0x197   :  { %v2126_v47 = vmul.f32 1.1920929e-07, %v2122_v56 }
 0x198   :  { %vm2128_vm0 = vcmp.ge.f32.partialorder %v2124_v40, 0.2  ;;  %v2127_v49 = vmul.f32 1.1920929e-07, %v2123_v41  ;;  %vm2129_vm1 = vcmp.ge.f32.partialorder %v2125_v43, 0.2 }
 0x199   :  { %v2132_v53 = vsel %vm2128_vm0, 1.25, %v2744_v52  ;;  %vm2130_vm2 = vcmp.ge.f32.partialorder %v2126_v47, 0.2  ;;  %v2133_v60 = vsel %vm2129_vm1, 1.25, %v2744_v52 }
 0x19a   :  { %vm2131_vm3 = vcmp.ge.f32.partialorder %v2127_v49, 0.2  ;;  %v2134_v3 = vsel %vm2130_vm2, 1.25, %v2744_v52 }
 0x19b   :  { %v2135_v14 = vsel %vm2131_vm3, 1.25, %v2744_v52 }
 0x206   :  { %v1908_v23 = vpop.f32.mrf.mxu0  ;;  %v1951_v24 = vpop.f32.mrf.mxu1 }
 0x207   :  { %v1909_v7 = vadd.f32 %v1908_v23, %v1227_v31 }
 0x208   :  { %v1910_v30 = vpop.f32.mrf.mxu0  ;;  %v1953_v32 = vpop.f32.mrf.mxu1 }
 0x209   :  { %v1911_v42 = vadd.f32 %v1910_v30, %v1231_v36  ;;  %v1952_v45 = vadd.f32 %v1951_v24, %v1909_v7 }
 0x20a   :  { %v1912_v38 = vpop.f32.mrf.mxu0  ;;  %v1955_v39 = vpop.f32.mrf.mxu1 }
 0x20b   :  { %v1913_v46 = vadd.f32 %v1912_v38, %v1227_v31  ;;  %v1954_v50 = vadd.f32 %v1953_v32, %v1911_v42 }
 0x20c   :  { %v1914_v44 = vpop.f32.mrf.mxu0  ;;  %v1957_v12 = vpop.f32.mrf.mxu1 }
 0x20d   :  { %v1915_v8 = vadd.f32 %v1914_v44, %v1231_v36  ;;  %v1956_v55 = vadd.f32 %v1955_v39, %v1913_v46 }
 0x20f   :  { %v1958_v62 = vadd.f32 %v1957_v12, %v1915_v8 }
 0x246   :  { %v1994_v48 = vpop.f32.mrf.mxu0  ;;  %v2037_v51 = vpop.f32.mrf.mxu1 }
 0x247   :  { %v1995_v10 = vadd.f32 %v1994_v48, %v1952_v45 }
 0x248   :  { %v1996_v54 = vpop.f32.mrf.mxu0  ;;  %v2039_v59 = vpop.f32.mrf.mxu1 }
 0x249   :  { %v2038_v57 = vadd.f32 %v2037_v51, %v1995_v10  ;;  %v1997_v58 = vadd.f32 %v1996_v54, %v1954_v50 }
 0x24a   :  { %v1998_v61 = vpop.f32.mrf.mxu0  ;;  %v2041_v2 = vpop.f32.mrf.mxu1 }
 0x24b   :  { %v2136_v63 = vmul.f32 %v2132_v53, %v2038_v57  ;;  %v2040_v0 = vadd.f32 %v2039_v59, %v1997_v58  ;;  %v1999_v1 = vadd.f32 %v1998_v61, %v1956_v55 }
 0x24c   :  { %v2000_v11 = vpop.f32.mrf.mxu0  ;;  %v2043_v13 = vpop.f32.mrf.mxu1 }
 0x24d   :  { %2140 = vst [vmem:[#allocation12] sm:$0xff] %v2136_v63  ;;  %v2137_v4 = vmul.f32 %v2133_v60, %v2040_v0  ;;  %v2042_v5 = vadd.f32 %v2041_v2, %v1999_v1  ;;  %v2001_v9 = vadd.f32 %v2000_v11, %v1958_v62 }
 0x24f   :  { %2141 = vst [vmem:[#allocation12 + $0x8] sm:$0xff] %v2137_v4  ;;  %v2138_v15 = vmul.f32 %v2134_v3, %v2042_v5  ;;  %v2044_v16 = vadd.f32 %v2043_v13, %v2001_v9 }
 0x251   :  { %2142 = vst [vmem:[#allocation12 + $0x10] sm:$0xff] %v2138_v15  ;;  %v2139_v17 = vmul.f32 %v2135_v14, %v2044_v16 }
 0x253   :  { %2143 = vst [vmem:[#allocation12 + $0x18] sm:$0xff] %v2139_v17 }
 0x254   :  { %2719 = shalt.err (!%p2716_p10)
}
 0x255   :  { %s2746_s22 = smov 256   ;;  %s2747_s23 = smov 16  }
 0x256   :  { %2155 = dma.vmem_to_hbm [thread:$0]  %s2150_s20, 512, %s2854_s6, [#allocation6], %s2746_s22, %s2746_s22, %s2747_s23  }
 0x257   :  { %2734 = dma.done.wait [#allocation6], 512  }
 0x258   :  { %2735 = vsyncadd [#allocation6], 4294966784 }
 0x259   :  { %2159 = vsyncpa [#allocation5], 1 }
 0x25a   :  { %2160 = vsyncpa [#allocation8], 1 }
 0x25b   :  { %2161 = vsyncpa [#allocation11], 1 }
 0x25c   :  { %2162 = vsyncpa [#allocation6], 1 }

</bundles_post_ra>
